<compile_context>
chip_gen: v6e
topology: v6e:2x2x1
jax: 0.10.0
libtpu: 0.0.40
codegen_flags: <defaults>
</compile_context>

<pallas_src>
import jax
import jax.numpy as jnp
import numpy as np
from jax.experimental import pallas as pl
from jax.experimental.pallas import tpu as pltpu

EMBED_DIM = 64
H_DIM = 64
NUM_LAYERS = 1
INPUT_DIM = 4


def _encoder_kernel(obs_ref, img_ref, wcomb_ref, wih_ref, whh_ref, bcomb_ref,
                    out_ref, cfin_ref):
    T, B, H = out_ref.shape

    # ---- Prologue (one shot, off the serial path):
    #      gates_pre = img @ W_ih^T + b_comb + sum_k obs[:, k] * W_comb[k, :]
    gates_pre = (jnp.dot(img_ref[...], wih_ref[...],
                         preferred_element_type=jnp.float32)
                 + bcomb_ref[...])                              # (T*B, 4H)
    obs = obs_ref[...]                                          # (T*B, 4)
    wcomb = wcomb_ref[...]                                      # (4, 4H)
    for k in range(INPUT_DIM):                                  # 4 VPU FMAs
        gates_pre = gates_pre + obs[:, k:k + 1] * wcomb[k:k + 1, :]

    whh = whh_ref[...]                                          # (H, 4H)

    # ---- Recurrence: only h_prev @ W_hh + elementwise on the serial path.
    #      Fully static Python loop -> static slices of gates_pre and static
    #      out_ref[t] writes (T is small and known at trace time).
    h = jnp.zeros((B, H), jnp.float32)   # init_hidden -> zeros
    c = jnp.zeros((B, H), jnp.float32)
    for t in range(T):
        gates = gates_pre[t * B:(t + 1) * B, :] + jnp.dot(
            h, whh, preferred_element_type=jnp.float32)         # (B, 4H)
        # PyTorch gate order [i, f, g, o]. One sigmoid over all 4H columns
        # (the g columns are discarded), one tanh on g, one tanh on c_new:
        # 3 EUP dispatches per step instead of 5.
        sig = jax.nn.sigmoid(gates)
        i_g = sig[:, 0 * H:1 * H]
        f_g = sig[:, 1 * H:2 * H]
        o_g = sig[:, 3 * H:4 * H]
        g_g = jnp.tanh(gates[:, 2 * H:3 * H])
        c = f_g * c + i_g * g_g
        h = o_g * jnp.tanh(c)
        out_ref[t] = h                                          # output[t] = h_t
    cfin_ref[...] = c                                           # c_n (layer 0)


def encoder_forward(obs_traj, img_embed, params):
    """obs_traj: (T, B, 4) f32; img_embed: (T, B, E) f32."""
    T, B, _ = obs_traj.shape
    E, H = EMBED_DIM, H_DIM

    # Flatten time*batch so the prologue is a single 2-D MXU pass.
    obs2d = obs_traj.reshape(T * B, INPUT_DIM)
    img2d = img_embed.reshape(T * B, E)

    wih = params["lstm_w_ih_t"]                                   # (E, 4H)
    whh = params["lstm_w_hh_t"]                                   # (H, 4H)
    # Fold the spatial Linear and all biases into the prologue weights
    # (wrapper-side; f32 re-association shifts results at ~1e-6 only).
    w_comb = params["spatial_w"] @ wih                            # (4, 4H)
    b_comb = params["spatial_b"] @ wih + params["lstm_b"]         # (1, 4H)

    out_shapes = (
        jax.ShapeDtypeStruct((T, B, H), jnp.float32),   # output (all h_t)
        jax.ShapeDtypeStruct((B, H), jnp.float32),      # c_n (layer 0)
    )

    grid_spec = pltpu.PrefetchScalarGridSpec(
        num_scalar_prefetch=0,
        grid=(1,),   # single program; whole problem (<1 MiB) is VMEM-resident
        in_specs=[
            pl.BlockSpec((T * B, INPUT_DIM), lambda i: (0, 0)),   # obs (flat)
            pl.BlockSpec((T * B, E), lambda i: (0, 0)),           # img (flat)
            pl.BlockSpec((INPUT_DIM, 4 * H), lambda i: (0, 0)),   # W_comb
            pl.BlockSpec((E, 4 * H), lambda i: (0, 0)),           # W_ih^T
            pl.BlockSpec((H, 4 * H), lambda i: (0, 0)),           # W_hh^T
            pl.BlockSpec((1, 4 * H), lambda i: (0, 0)),           # b_comb
        ],
        out_specs=[
            pl.BlockSpec((T, B, H), lambda i: (0, 0, 0)),         # output
            pl.BlockSpec((B, H), lambda i: (0, 0)),               # c_n
        ],
    )

    # Advisory cost estimate: prologue matmul + recurrence matmuls + EUP work.
    flops = int(2 * T * B * E * 4 * H            # img @ W_ih^T
                + 2 * T * B * INPUT_DIM * 4 * H  # obs FMAs
                + 2 * T * B * H * 4 * H          # h @ W_hh^T (T steps)
                + 12 * T * B * H)                # gate elementwise
    transcendentals = int(T * B * (4 * H + 2 * H))
    bytes_accessed = int(4 * (T * B * INPUT_DIM + T * B * E
                              + INPUT_DIM * 4 * H + E * 4 * H + H * 4 * H
                              + 4 * H + T * B * H + B * H))

    output, c_last = pl.pallas_call(
        _encoder_kernel,
        out_shape=out_shapes,
        grid_spec=grid_spec,
        compiler_params=pltpu.CompilerParams(
            dimension_semantics=("arbitrary",)),
        cost_estimate=pl.CostEstimate(flops=flops,
                                      transcendentals=transcendentals,
                                      bytes_accessed=bytes_accessed),
    )(obs2d, img2d, w_comb, wih, whh, b_comb)

    # h_n is the last output step (num_layers == 1); slice in the wrapper.
    h_n = output[T - 1:T]          # (1, B, H)
    c_n = c_last[None]             # (1, B, H)
    return {"final_h": (h_n, c_n), "output": output}


def _make_params(key):
    """Deterministic synthetic params matching PyTorch module shapes."""
    E, H = EMBED_DIM, H_DIM
    k = jax.random.split(key, 6)
    # nn.Linear(4, E): weight (E, 4), bias (E). Store transposed weight (4, E).
    spatial_w = jax.random.normal(k[0], (INPUT_DIM, E), jnp.float32) * 0.1
    spatial_b = jax.random.normal(k[1], (1, E), jnp.float32) * 0.1
    # nn.LSTM(E, H): weight_ih_l0 (4H, E), weight_hh_l0 (4H, H), biases (4H,).
    w_ih = jax.random.normal(k[2], (4 * H, E), jnp.float32) * 0.1
    w_hh = jax.random.normal(k[3], (4 * H, H), jnp.float32) * 0.1
    b_ih = jax.random.normal(k[4], (4 * H,), jnp.float32) * 0.1
    b_hh = jax.random.normal(k[5], (4 * H,), jnp.float32) * 0.1
    return {
        "spatial_w": spatial_w,
        "spatial_b": spatial_b,
        "lstm_w_ih_t": w_ih.T,                         # (E, 4H)
        "lstm_w_hh_t": w_hh.T,                         # (H, 4H)
        "lstm_b": (b_ih + b_hh)[None, :],              # (1, 4H)
    }


def _reference_forward(obs_traj, img_embed, params):
    """Pure-JAX reference (same math as torch, no weight folding)."""
    H = H_DIM
    emb = obs_traj @ params["spatial_w"] + params["spatial_b"][0]
    x = emb + img_embed                                 # (T, B, E)
    B = x.shape[1]

    def step(carry, x_t):
        h, c = carry
        gates = x_t @ params["lstm_w_ih_t"] + h @ params["lstm_w_hh_t"] \
            + params["lstm_b"][0]
        i = jax.nn.sigmoid(gates[:, 0 * H:1 * H])
        f = jax.nn.sigmoid(gates[:, 1 * H:2 * H])
        g = jnp.tanh(gates[:, 2 * H:3 * H])
        o = jax.nn.sigmoid(gates[:, 3 * H:4 * H])
        c_new = f * c + i * g
        h_new = o * jnp.tanh(c_new)
        return (h_new, c_new), h_new

    h0 = jnp.zeros((B, H), jnp.float32)
    c0 = jnp.zeros((B, H), jnp.float32)
    (h_n, c_n), out = jax.lax.scan(step, (h0, c0), x)
    return {"final_h": (h_n[None], c_n[None]), "output": out}


if __name__ == "__main__":
    key = jax.random.PRNGKey(0)
    k_obs, k_img, k_par = jax.random.split(key, 3)

    # obs_len=8; batch=8 (multiple of the 8-sublane vreg height — batching is
    # the biggest structural lever for this latency-bound kernel).
    T, B = 8, 8
    obs_traj = jax.random.normal(k_obs, (T, B, INPUT_DIM), jnp.float32)
    img_embed = jax.random.normal(k_img, (T, B, EMBED_DIM), jnp.float32)
    params = _make_params(k_par)

    result = encoder_forward(obs_traj, img_embed, params)
    jax.block_until_ready(result)

    ref = _reference_forward(obs_traj, img_embed, params)
    np.testing.assert_allclose(np.asarray(result["output"]),
                               np.asarray(ref["output"]), atol=2e-5, rtol=2e-5)
    np.testing.assert_allclose(np.asarray(result["final_h"][0]),
                               np.asarray(ref["final_h"][0]), atol=2e-5, rtol=2e-5)
    np.testing.assert_allclose(np.asarray(result["final_h"][1]),
                               np.asarray(ref["final_h"][1]), atol=2e-5, rtol=2e-5)

    assert result["output"].shape == (T, B, H_DIM)
    assert result["final_h"][0].shape == (NUM_LAYERS, B, H_DIM)
    assert result["final_h"][1].shape == (NUM_LAYERS, B, H_DIM)
    print("KERNEL_OK")
</pallas_src>

<mosaic_0001>
module attributes {stable_mosaic.version = 11 : i64} {
  func.func @_encoder_kernel(%arg0: i32, %arg1: memref<64x4xf32, #tpu.memory_space<vmem>>, %arg2: memref<64x64xf32, #tpu.memory_space<vmem>>, %arg3: memref<4x256xf32, #tpu.memory_space<vmem>>, %arg4: memref<64x256xf32, #tpu.memory_space<vmem>>, %arg5: memref<64x256xf32, #tpu.memory_space<vmem>>, %arg6: memref<1x256xf32, #tpu.memory_space<vmem>>, %arg7: memref<8x8x64xf32, #tpu.memory_space<vmem>>, %arg8: memref<8x64xf32, #tpu.memory_space<vmem>>) attributes {dimension_semantics = [#tpu.dimension_semantics<arbitrary>], iteration_bounds = array<i64: 1>, scalar_prefetch = 0 : i64, scratch_operands = 0 : i64, tpu.core_type = #tpu.core_type<tc>, window_params = [{pipeline_mode = #tpu.pipeline_mode<synchronous>, transform_indices = @transform_0, window_bounds = array<i64: 64, 4>}, {pipeline_mode = #tpu.pipeline_mode<synchronous>, transform_indices = @transform_1, window_bounds = array<i64: 64, 64>}, {pipeline_mode = #tpu.pipeline_mode<synchronous>, transform_indices = @transform_2, window_bounds = array<i64: 4, 256>}, {pipeline_mode = #tpu.pipeline_mode<synchronous>, transform_indices = @transform_3, window_bounds = array<i64: 64, 256>}, {pipeline_mode = #tpu.pipeline_mode<synchronous>, transform_indices = @transform_4, window_bounds = array<i64: 64, 256>}, {pipeline_mode = #tpu.pipeline_mode<synchronous>, transform_indices = @transform_5, window_bounds = array<i64: 1, 256>}, {pipeline_mode = #tpu.pipeline_mode<synchronous>, transform_indices = @transform_6, window_bounds = array<i64: 8, 8, 64>}, {pipeline_mode = #tpu.pipeline_mode<synchronous>, transform_indices = @transform_7, window_bounds = array<i64: 8, 64>}]} {
    %c0 = arith.constant 0 : index
    %c0_0 = arith.constant 0 : index
    %0 = vector.load %arg2[%c0, %c0_0] : memref<64x64xf32, #tpu.memory_space<vmem>>, vector<64x64xf32>
    %c0_1 = arith.constant 0 : index
    %c0_2 = arith.constant 0 : index
    %1 = vector.load %arg4[%c0_1, %c0_2] : memref<64x256xf32, #tpu.memory_space<vmem>>, vector<64x256xf32>
    %cst = arith.constant dense<0.000000e+00> : vector<64x256xf32>
    %2 = tpu.matmul %0, %1, %cst {dimension_numbers = #tpu.dot_dimension_numbers<[1], [0], [0], [1], [0, 0, 1, 1], [], []>} : vector<64x64xf32>, vector<64x256xf32>, vector<64x256xf32> -> vector<64x256xf32>
    %c0_3 = arith.constant 0 : index
    %c0_4 = arith.constant 0 : index
    %3 = vector.load %arg6[%c0_3, %c0_4] : memref<1x256xf32, #tpu.memory_space<vmem>>, vector<1x256xf32>
    %4 = vector.broadcast %3 : vector<1x256xf32> to vector<64x256xf32>
    %5 = arith.addf %2, %4 : vector<64x256xf32>
    %c0_5 = arith.constant 0 : index
    %c0_6 = arith.constant 0 : index
    %6 = vector.load %arg1[%c0_5, %c0_6] : memref<64x4xf32, #tpu.memory_space<vmem>>, vector<64x4xf32>
    %c0_7 = arith.constant 0 : index
    %c0_8 = arith.constant 0 : index
    %7 = vector.load %arg3[%c0_7, %c0_8] : memref<4x256xf32, #tpu.memory_space<vmem>>, vector<4x256xf32>
    %8 = vector.extract_strided_slice %6 {offsets = [0, 0], sizes = [64, 1], strides = [1, 1]} : vector<64x4xf32> to vector<64x1xf32>
    %9 = vector.extract_strided_slice %7 {offsets = [0, 0], sizes = [1, 256], strides = [1, 1]} : vector<4x256xf32> to vector<1x256xf32>
    %10 = vector.broadcast %8 : vector<64x1xf32> to vector<64x256xf32>
    %11 = vector.broadcast %9 : vector<1x256xf32> to vector<64x256xf32>
    %12 = arith.mulf %10, %11 : vector<64x256xf32>
    %13 = arith.addf %5, %12 : vector<64x256xf32>
    %14 = vector.extract_strided_slice %6 {offsets = [0, 1], sizes = [64, 1], strides = [1, 1]} : vector<64x4xf32> to vector<64x1xf32>
    %15 = vector.extract_strided_slice %7 {offsets = [1, 0], sizes = [1, 256], strides = [1, 1]} : vector<4x256xf32> to vector<1x256xf32>
    %16 = vector.broadcast %14 : vector<64x1xf32> to vector<64x256xf32>
    %17 = vector.broadcast %15 : vector<1x256xf32> to vector<64x256xf32>
    %18 = arith.mulf %16, %17 : vector<64x256xf32>
    %19 = arith.addf %13, %18 : vector<64x256xf32>
    %20 = vector.extract_strided_slice %6 {offsets = [0, 2], sizes = [64, 1], strides = [1, 1]} : vector<64x4xf32> to vector<64x1xf32>
    %21 = vector.extract_strided_slice %7 {offsets = [2, 0], sizes = [1, 256], strides = [1, 1]} : vector<4x256xf32> to vector<1x256xf32>
    %22 = vector.broadcast %20 : vector<64x1xf32> to vector<64x256xf32>
    %23 = vector.broadcast %21 : vector<1x256xf32> to vector<64x256xf32>
    %24 = arith.mulf %22, %23 : vector<64x256xf32>
    %25 = arith.addf %19, %24 : vector<64x256xf32>
    %26 = vector.extract_strided_slice %6 {offsets = [0, 3], sizes = [64, 1], strides = [1, 1]} : vector<64x4xf32> to vector<64x1xf32>
    %27 = vector.extract_strided_slice %7 {offsets = [3, 0], sizes = [1, 256], strides = [1, 1]} : vector<4x256xf32> to vector<1x256xf32>
    %28 = vector.broadcast %26 : vector<64x1xf32> to vector<64x256xf32>
    %29 = vector.broadcast %27 : vector<1x256xf32> to vector<64x256xf32>
    %30 = arith.mulf %28, %29 : vector<64x256xf32>
    %31 = arith.addf %25, %30 : vector<64x256xf32>
    %c0_9 = arith.constant 0 : index
    %c0_10 = arith.constant 0 : index
    %32 = vector.load %arg5[%c0_9, %c0_10] : memref<64x256xf32, #tpu.memory_space<vmem>>, vector<64x256xf32>
    %cst_11 = arith.constant 0.000000e+00 : f32
    %33 = vector.broadcast %cst_11 : f32 to vector<8x64xf32>
    %cst_12 = arith.constant 0.000000e+00 : f32
    %34 = vector.broadcast %cst_12 : f32 to vector<8x64xf32>
    %35 = vector.extract_strided_slice %31 {offsets = [0, 0], sizes = [8, 256], strides = [1, 1]} : vector<64x256xf32> to vector<8x256xf32>
    %cst_13 = arith.constant dense<0.000000e+00> : vector<8x256xf32>
    %36 = tpu.matmul %33, %32, %cst_13 {dimension_numbers = #tpu.dot_dimension_numbers<[1], [0], [0], [1], [0, 0, 1, 1], [], []>} : vector<8x64xf32>, vector<64x256xf32>, vector<8x256xf32> -> vector<8x256xf32>
    %37 = arith.addf %35, %36 : vector<8x256xf32>
    %38 = arith.negf %37 : vector<8x256xf32>
    %39 = math.exp %38 : vector<8x256xf32>
    %cst_14 = arith.constant 1.000000e+00 : f32
    %40 = vector.broadcast %cst_14 : f32 to vector<8x256xf32>
    %41 = arith.addf %40, %39 : vector<8x256xf32>
    %42 = arith.divf %40, %41 : vector<8x256xf32>
    %43 = vector.extract_strided_slice %42 {offsets = [0, 0], sizes = [8, 64], strides = [1, 1]} : vector<8x256xf32> to vector<8x64xf32>
    %44 = vector.extract_strided_slice %42 {offsets = [0, 64], sizes = [8, 64], strides = [1, 1]} : vector<8x256xf32> to vector<8x64xf32>
    %45 = vector.extract_strided_slice %42 {offsets = [0, 192], sizes = [8, 64], strides = [1, 1]} : vector<8x256xf32> to vector<8x64xf32>
    %46 = vector.extract_strided_slice %37 {offsets = [0, 128], sizes = [8, 64], strides = [1, 1]} : vector<8x256xf32> to vector<8x64xf32>
    %47 = math.tanh %46 : vector<8x64xf32>
    %48 = arith.mulf %44, %34 : vector<8x64xf32>
    %49 = arith.mulf %43, %47 : vector<8x64xf32>
    %50 = arith.addf %48, %49 : vector<8x64xf32>
    %51 = math.tanh %50 : vector<8x64xf32>
    %52 = arith.mulf %45, %51 : vector<8x64xf32>
    %c0_15 = arith.constant 0 : index
    %c0_16 = arith.constant 0 : index
    %c0_17 = arith.constant 0 : index
    %53 = vector.load %arg7[%c0_15, %c0_16, %c0_17] : memref<8x8x64xf32, #tpu.memory_space<vmem>>, vector<1x8x64xf32>
    %54 = vector.shape_cast %53 : vector<1x8x64xf32> to vector<8x64xf32>
    %55 = vector.shape_cast %52 : vector<8x64xf32> to vector<1x8x64xf32>
    tpu.vector_store %arg7[%c0_15, %c0_16, %c0_17], %55 {strides = array<i32>} : memref<8x8x64xf32, #tpu.memory_space<vmem>>, vector<1x8x64xf32>,
    %56 = vector.extract_strided_slice %31 {offsets = [8, 0], sizes = [8, 256], strides = [1, 1]} : vector<64x256xf32> to vector<8x256xf32>
    %cst_18 = arith.constant dense<0.000000e+00> : vector<8x256xf32>
    %57 = tpu.matmul %52, %32, %cst_18 {dimension_numbers = #tpu.dot_dimension_numbers<[1], [0], [0], [1], [0, 0, 1, 1], [], []>} : vector<8x64xf32>, vector<64x256xf32>, vector<8x256xf32> -> vector<8x256xf32>
    %58 = arith.addf %56, %57 : vector<8x256xf32>
    %59 = arith.negf %58 : vector<8x256xf32>
    %60 = math.exp %59 : vector<8x256xf32>
    %cst_19 = arith.constant 1.000000e+00 : f32
    %61 = vector.broadcast %cst_19 : f32 to vector<8x256xf32>
    %62 = arith.addf %61, %60 : vector<8x256xf32>
    %63 = arith.divf %61, %62 : vector<8x256xf32>
    %64 = vector.extract_strided_slice %63 {offsets = [0, 0], sizes = [8, 64], strides = [1, 1]} : vector<8x256xf32> to vector<8x64xf32>
    %65 = vector.extract_strided_slice %63 {offsets = [0, 64], sizes = [8, 64], strides = [1, 1]} : vector<8x256xf32> to vector<8x64xf32>
    %66 = vector.extract_strided_slice %63 {offsets = [0, 192], sizes = [8, 64], strides = [1, 1]} : vector<8x256xf32> to vector<8x64xf32>
    %67 = vector.extract_strided_slice %58 {offsets = [0, 128], sizes = [8, 64], strides = [1, 1]} : vector<8x256xf32> to vector<8x64xf32>
    %68 = math.tanh %67 : vector<8x64xf32>
    %69 = arith.mulf %65, %50 : vector<8x64xf32>
    %70 = arith.mulf %64, %68 : vector<8x64xf32>
    %71 = arith.addf %69, %70 : vector<8x64xf32>
    %72 = math.tanh %71 : vector<8x64xf32>
    %73 = arith.mulf %66, %72 : vector<8x64xf32>
    %c1 = arith.constant 1 : index
    %c0_20 = arith.constant 0 : index
    %c0_21 = arith.constant 0 : index
    %74 = vector.load %arg7[%c1, %c0_20, %c0_21] : memref<8x8x64xf32, #tpu.memory_space<vmem>>, vector<1x8x64xf32>
    %75 = vector.shape_cast %74 : vector<1x8x64xf32> to vector<8x64xf32>
    %76 = vector.shape_cast %73 : vector<8x64xf32> to vector<1x8x64xf32>
    tpu.vector_store %arg7[%c1, %c0_20, %c0_21], %76 {strides = array<i32>} : memref<8x8x64xf32, #tpu.memory_space<vmem>>, vector<1x8x64xf32>,
    %77 = vector.extract_strided_slice %31 {offsets = [16, 0], sizes = [8, 256], strides = [1, 1]} : vector<64x256xf32> to vector<8x256xf32>
    %cst_22 = arith.constant dense<0.000000e+00> : vector<8x256xf32>
    %78 = tpu.matmul %73, %32, %cst_22 {dimension_numbers = #tpu.dot_dimension_numbers<[1], [0], [0], [1], [0, 0, 1, 1], [], []>} : vector<8x64xf32>, vector<64x256xf32>, vector<8x256xf32> -> vector<8x256xf32>
    %79 = arith.addf %77, %78 : vector<8x256xf32>
    %80 = arith.negf %79 : vector<8x256xf32>
    %81 = math.exp %80 : vector<8x256xf32>
    %cst_23 = arith.constant 1.000000e+00 : f32
    %82 = vector.broadcast %cst_23 : f32 to vector<8x256xf32>
    %83 = arith.addf %82, %81 : vector<8x256xf32>
    %84 = arith.divf %82, %83 : vector<8x256xf32>
    %85 = vector.extract_strided_slice %84 {offsets = [0, 0], sizes = [8, 64], strides = [1, 1]} : vector<8x256xf32> to vector<8x64xf32>
    %86 = vector.extract_strided_slice %84 {offsets = [0, 64], sizes = [8, 64], strides = [1, 1]} : vector<8x256xf32> to vector<8x64xf32>
    %87 = vector.extract_strided_slice %84 {offsets = [0, 192], sizes = [8, 64], strides = [1, 1]} : vector<8x256xf32> to vector<8x64xf32>
    %88 = vector.extract_strided_slice %79 {offsets = [0, 128], sizes = [8, 64], strides = [1, 1]} : vector<8x256xf32> to vector<8x64xf32>
    %89 = math.tanh %88 : vector<8x64xf32>
    %90 = arith.mulf %86, %71 : vector<8x64xf32>
    %91 = arith.mulf %85, %89 : vector<8x64xf32>
    %92 = arith.addf %90, %91 : vector<8x64xf32>
    %93 = math.tanh %92 : vector<8x64xf32>
    %94 = arith.mulf %87, %93 : vector<8x64xf32>
    %c2 = arith.constant 2 : index
    %c0_24 = arith.constant 0 : index
    %c0_25 = arith.constant 0 : index
    %95 = vector.load %arg7[%c2, %c0_24, %c0_25] : memref<8x8x64xf32, #tpu.memory_space<vmem>>, vector<1x8x64xf32>
    %96 = vector.shape_cast %95 : vector<1x8x64xf32> to vector<8x64xf32>
    %97 = vector.shape_cast %94 : vector<8x64xf32> to vector<1x8x64xf32>
    tpu.vector_store %arg7[%c2, %c0_24, %c0_25], %97 {strides = array<i32>} : memref<8x8x64xf32, #tpu.memory_space<vmem>>, vector<1x8x64xf32>,
    %98 = vector.extract_strided_slice %31 {offsets = [24, 0], sizes = [8, 256], strides = [1, 1]} : vector<64x256xf32> to vector<8x256xf32>
    %cst_26 = arith.constant dense<0.000000e+00> : vector<8x256xf32>
    %99 = tpu.matmul %94, %32, %cst_26 {dimension_numbers = #tpu.dot_dimension_numbers<[1], [0], [0], [1], [0, 0, 1, 1], [], []>} : vector<8x64xf32>, vector<64x256xf32>, vector<8x256xf32> -> vector<8x256xf32>
    %100 = arith.addf %98, %99 : vector<8x256xf32>
    %101 = arith.negf %100 : vector<8x256xf32>
    %102 = math.exp %101 : vector<8x256xf32>
    %cst_27 = arith.constant 1.000000e+00 : f32
    %103 = vector.broadcast %cst_27 : f32 to vector<8x256xf32>
    %104 = arith.addf %103, %102 : vector<8x256xf32>
    %105 = arith.divf %103, %104 : vector<8x256xf32>
    %106 = vector.extract_strided_slice %105 {offsets = [0, 0], sizes = [8, 64], strides = [1, 1]} : vector<8x256xf32> to vector<8x64xf32>
    %107 = vector.extract_strided_slice %105 {offsets = [0, 64], sizes = [8, 64], strides = [1, 1]} : vector<8x256xf32> to vector<8x64xf32>
    %108 = vector.extract_strided_slice %105 {offsets = [0, 192], sizes = [8, 64], strides = [1, 1]} : vector<8x256xf32> to vector<8x64xf32>
    %109 = vector.extract_strided_slice %100 {offsets = [0, 128], sizes = [8, 64], strides = [1, 1]} : vector<8x256xf32> to vector<8x64xf32>
    %110 = math.tanh %109 : vector<8x64xf32>
    %111 = arith.mulf %107, %92 : vector<8x64xf32>
    %112 = arith.mulf %106, %110 : vector<8x64xf32>
    %113 = arith.addf %111, %112 : vector<8x64xf32>
    %114 = math.tanh %113 : vector<8x64xf32>
    %115 = arith.mulf %108, %114 : vector<8x64xf32>
    %c3 = arith.constant 3 : index
    %c0_28 = arith.constant 0 : index
    %c0_29 = arith.constant 0 : index
    %116 = vector.load %arg7[%c3, %c0_28, %c0_29] : memref<8x8x64xf32, #tpu.memory_space<vmem>>, vector<1x8x64xf32>
    %117 = vector.shape_cast %116 : vector<1x8x64xf32> to vector<8x64xf32>
    %118 = vector.shape_cast %115 : vector<8x64xf32> to vector<1x8x64xf32>
    tpu.vector_store %arg7[%c3, %c0_28, %c0_29], %118 {strides = array<i32>} : memref<8x8x64xf32, #tpu.memory_space<vmem>>, vector<1x8x64xf32>,
    %119 = vector.extract_strided_slice %31 {offsets = [32, 0], sizes = [8, 256], strides = [1, 1]} : vector<64x256xf32> to vector<8x256xf32>
    %cst_30 = arith.constant dense<0.000000e+00> : vector<8x256xf32>
    %120 = tpu.matmul %115, %32, %cst_30 {dimension_numbers = #tpu.dot_dimension_numbers<[1], [0], [0], [1], [0, 0, 1, 1], [], []>} : vector<8x64xf32>, vector<64x256xf32>, vector<8x256xf32> -> vector<8x256xf32>
    %121 = arith.addf %119, %120 : vector<8x256xf32>
    %122 = arith.negf %121 : vector<8x256xf32>
    %123 = math.exp %122 : vector<8x256xf32>
    %cst_31 = arith.constant 1.000000e+00 : f32
    %124 = vector.broadcast %cst_31 : f32 to vector<8x256xf32>
    %125 = arith.addf %124, %123 : vector<8x256xf32>
    %126 = arith.divf %124, %125 : vector<8x256xf32>
    %127 = vector.extract_strided_slice %126 {offsets = [0, 0], sizes = [8, 64], strides = [1, 1]} : vector<8x256xf32> to vector<8x64xf32>
    %128 = vector.extract_strided_slice %126 {offsets = [0, 64], sizes = [8, 64], strides = [1, 1]} : vector<8x256xf32> to vector<8x64xf32>
    %129 = vector.extract_strided_slice %126 {offsets = [0, 192], sizes = [8, 64], strides = [1, 1]} : vector<8x256xf32> to vector<8x64xf32>
    %130 = vector.extract_strided_slice %121 {offsets = [0, 128], sizes = [8, 64], strides = [1, 1]} : vector<8x256xf32> to vector<8x64xf32>
    %131 = math.tanh %130 : vector<8x64xf32>
    %132 = arith.mulf %128, %113 : vector<8x64xf32>
    %133 = arith.mulf %127, %131 : vector<8x64xf32>
    %134 = arith.addf %132, %133 : vector<8x64xf32>
    %135 = math.tanh %134 : vector<8x64xf32>
    %136 = arith.mulf %129, %135 : vector<8x64xf32>
    %c4 = arith.constant 4 : index
    %c0_32 = arith.constant 0 : index
    %c0_33 = arith.constant 0 : index
    %137 = vector.load %arg7[%c4, %c0_32, %c0_33] : memref<8x8x64xf32, #tpu.memory_space<vmem>>, vector<1x8x64xf32>
    %138 = vector.shape_cast %137 : vector<1x8x64xf32> to vector<8x64xf32>
    %139 = vector.shape_cast %136 : vector<8x64xf32> to vector<1x8x64xf32>
    tpu.vector_store %arg7[%c4, %c0_32, %c0_33], %139 {strides = array<i32>} : memref<8x8x64xf32, #tpu.memory_space<vmem>>, vector<1x8x64xf32>,
    %140 = vector.extract_strided_slice %31 {offsets = [40, 0], sizes = [8, 256], strides = [1, 1]} : vector<64x256xf32> to vector<8x256xf32>
    %cst_34 = arith.constant dense<0.000000e+00> : vector<8x256xf32>
    %141 = tpu.matmul %136, %32, %cst_34 {dimension_numbers = #tpu.dot_dimension_numbers<[1], [0], [0], [1], [0, 0, 1, 1], [], []>} : vector<8x64xf32>, vector<64x256xf32>, vector<8x256xf32> -> vector<8x256xf32>
    %142 = arith.addf %140, %141 : vector<8x256xf32>
    %143 = arith.negf %142 : vector<8x256xf32>
    %144 = math.exp %143 : vector<8x256xf32>
    %cst_35 = arith.constant 1.000000e+00 : f32
    %145 = vector.broadcast %cst_35 : f32 to vector<8x256xf32>
    %146 = arith.addf %145, %144 : vector<8x256xf32>
    %147 = arith.divf %145, %146 : vector<8x256xf32>
    %148 = vector.extract_strided_slice %147 {offsets = [0, 0], sizes = [8, 64], strides = [1, 1]} : vector<8x256xf32> to vector<8x64xf32>
    %149 = vector.extract_strided_slice %147 {offsets = [0, 64], sizes = [8, 64], strides = [1, 1]} : vector<8x256xf32> to vector<8x64xf32>
    %150 = vector.extract_strided_slice %147 {offsets = [0, 192], sizes = [8, 64], strides = [1, 1]} : vector<8x256xf32> to vector<8x64xf32>
    %151 = vector.extract_strided_slice %142 {offsets = [0, 128], sizes = [8, 64], strides = [1, 1]} : vector<8x256xf32> to vector<8x64xf32>
    %152 = math.tanh %151 : vector<8x64xf32>
    %153 = arith.mulf %149, %134 : vector<8x64xf32>
    %154 = arith.mulf %148, %152 : vector<8x64xf32>
    %155 = arith.addf %153, %154 : vector<8x64xf32>
    %156 = math.tanh %155 : vector<8x64xf32>
    %157 = arith.mulf %150, %156 : vector<8x64xf32>
    %c5 = arith.constant 5 : index
    %c0_36 = arith.constant 0 : index
    %c0_37 = arith.constant 0 : index
    %158 = vector.load %arg7[%c5, %c0_36, %c0_37] : memref<8x8x64xf32, #tpu.memory_space<vmem>>, vector<1x8x64xf32>
    %159 = vector.shape_cast %158 : vector<1x8x64xf32> to vector<8x64xf32>
    %160 = vector.shape_cast %157 : vector<8x64xf32> to vector<1x8x64xf32>
    tpu.vector_store %arg7[%c5, %c0_36, %c0_37], %160 {strides = array<i32>} : memref<8x8x64xf32, #tpu.memory_space<vmem>>, vector<1x8x64xf32>,
    %161 = vector.extract_strided_slice %31 {offsets = [48, 0], sizes = [8, 256], strides = [1, 1]} : vector<64x256xf32> to vector<8x256xf32>
    %cst_38 = arith.constant dense<0.000000e+00> : vector<8x256xf32>
    %162 = tpu.matmul %157, %32, %cst_38 {dimension_numbers = #tpu.dot_dimension_numbers<[1], [0], [0], [1], [0, 0, 1, 1], [], []>} : vector<8x64xf32>, vector<64x256xf32>, vector<8x256xf32> -> vector<8x256xf32>
    %163 = arith.addf %161, %162 : vector<8x256xf32>
    %164 = arith.negf %163 : vector<8x256xf32>
    %165 = math.exp %164 : vector<8x256xf32>
    %cst_39 = arith.constant 1.000000e+00 : f32
    %166 = vector.broadcast %cst_39 : f32 to vector<8x256xf32>
    %167 = arith.addf %166, %165 : vector<8x256xf32>
    %168 = arith.divf %166, %167 : vector<8x256xf32>
    %169 = vector.extract_strided_slice %168 {offsets = [0, 0], sizes = [8, 64], strides = [1, 1]} : vector<8x256xf32> to vector<8x64xf32>
    %170 = vector.extract_strided_slice %168 {offsets = [0, 64], sizes = [8, 64], strides = [1, 1]} : vector<8x256xf32> to vector<8x64xf32>
    %171 = vector.extract_strided_slice %168 {offsets = [0, 192], sizes = [8, 64], strides = [1, 1]} : vector<8x256xf32> to vector<8x64xf32>
    %172 = vector.extract_strided_slice %163 {offsets = [0, 128], sizes = [8, 64], strides = [1, 1]} : vector<8x256xf32> to vector<8x64xf32>
    %173 = math.tanh %172 : vector<8x64xf32>
    %174 = arith.mulf %170, %155 : vector<8x64xf32>
    %175 = arith.mulf %169, %173 : vector<8x64xf32>
    %176 = arith.addf %174, %175 : vector<8x64xf32>
    %177 = math.tanh %176 : vector<8x64xf32>
    %178 = arith.mulf %171, %177 : vector<8x64xf32>
    %c6 = arith.constant 6 : index
    %c0_40 = arith.constant 0 : index
    %c0_41 = arith.constant 0 : index
    %179 = vector.load %arg7[%c6, %c0_40, %c0_41] : memref<8x8x64xf32, #tpu.memory_space<vmem>>, vector<1x8x64xf32>
    %180 = vector.shape_cast %179 : vector<1x8x64xf32> to vector<8x64xf32>
    %181 = vector.shape_cast %178 : vector<8x64xf32> to vector<1x8x64xf32>
    tpu.vector_store %arg7[%c6, %c0_40, %c0_41], %181 {strides = array<i32>} : memref<8x8x64xf32, #tpu.memory_space<vmem>>, vector<1x8x64xf32>,
    %182 = vector.extract_strided_slice %31 {offsets = [56, 0], sizes = [8, 256], strides = [1, 1]} : vector<64x256xf32> to vector<8x256xf32>
    %cst_42 = arith.constant dense<0.000000e+00> : vector<8x256xf32>
    %183 = tpu.matmul %178, %32, %cst_42 {dimension_numbers = #tpu.dot_dimension_numbers<[1], [0], [0], [1], [0, 0, 1, 1], [], []>} : vector<8x64xf32>, vector<64x256xf32>, vector<8x256xf32> -> vector<8x256xf32>
    %184 = arith.addf %182, %183 : vector<8x256xf32>
    %185 = arith.negf %184 : vector<8x256xf32>
    %186 = math.exp %185 : vector<8x256xf32>
    %cst_43 = arith.constant 1.000000e+00 : f32
    %187 = vector.broadcast %cst_43 : f32 to vector<8x256xf32>
    %188 = arith.addf %187, %186 : vector<8x256xf32>
    %189 = arith.divf %187, %188 : vector<8x256xf32>
    %190 = vector.extract_strided_slice %189 {offsets = [0, 0], sizes = [8, 64], strides = [1, 1]} : vector<8x256xf32> to vector<8x64xf32>
    %191 = vector.extract_strided_slice %189 {offsets = [0, 64], sizes = [8, 64], strides = [1, 1]} : vector<8x256xf32> to vector<8x64xf32>
    %192 = vector.extract_strided_slice %189 {offsets = [0, 192], sizes = [8, 64], strides = [1, 1]} : vector<8x256xf32> to vector<8x64xf32>
    %193 = vector.extract_strided_slice %184 {offsets = [0, 128], sizes = [8, 64], strides = [1, 1]} : vector<8x256xf32> to vector<8x64xf32>
    %194 = math.tanh %193 : vector<8x64xf32>
    %195 = arith.mulf %191, %176 : vector<8x64xf32>
    %196 = arith.mulf %190, %194 : vector<8x64xf32>
    %197 = arith.addf %195, %196 : vector<8x64xf32>
    %198 = math.tanh %197 : vector<8x64xf32>
    %199 = arith.mulf %192, %198 : vector<8x64xf32>
    %c7 = arith.constant 7 : index
    %c0_44 = arith.constant 0 : index
    %c0_45 = arith.constant 0 : index
    %200 = vector.load %arg7[%c7, %c0_44, %c0_45] : memref<8x8x64xf32, #tpu.memory_space<vmem>>, vector<1x8x64xf32>
    %201 = vector.shape_cast %200 : vector<1x8x64xf32> to vector<8x64xf32>
    %202 = vector.shape_cast %199 : vector<8x64xf32> to vector<1x8x64xf32>
    tpu.vector_store %arg7[%c7, %c0_44, %c0_45], %202 {strides = array<i32>} : memref<8x8x64xf32, #tpu.memory_space<vmem>>, vector<1x8x64xf32>,
    %c0_46 = arith.constant 0 : index
    %c0_47 = arith.constant 0 : index
    %203 = vector.load %arg8[%c0_46, %c0_47] : memref<8x64xf32, #tpu.memory_space<vmem>>, vector<8x64xf32>
    tpu.vector_store %arg8[%c0_46, %c0_47], %197 {strides = array<i32>} : memref<8x64xf32, #tpu.memory_space<vmem>>, vector<8x64xf32>,
    return
  }
  func.func @transform_0(%arg0: i32) -> (i32, i32) {
    %c0_i32 = arith.constant 0 : i32
    %c0_i32_0 = arith.constant 0 : i32
    %c0_i32_1 = arith.constant 0 : i32
    return %c0_i32, %c0_i32_0 : i32, i32
  }
  func.func @transform_1(%arg0: i32) -> (i32, i32) {
    %c0_i32 = arith.constant 0 : i32
    %c0_i32_0 = arith.constant 0 : i32
    %c0_i32_1 = arith.constant 0 : i32
    return %c0_i32, %c0_i32_0 : i32, i32
  }
  func.func @transform_2(%arg0: i32) -> (i32, i32) {
    %c0_i32 = arith.constant 0 : i32
    %c0_i32_0 = arith.constant 0 : i32
    %c0_i32_1 = arith.constant 0 : i32
    return %c0_i32, %c0_i32_0 : i32, i32
  }
  func.func @transform_3(%arg0: i32) -> (i32, i32) {
    %c0_i32 = arith.constant 0 : i32
    %c0_i32_0 = arith.constant 0 : i32
    %c0_i32_1 = arith.constant 0 : i32
    return %c0_i32, %c0_i32_0 : i32, i32
  }
  func.func @transform_4(%arg0: i32) -> (i32, i32) {
    %c0_i32 = arith.constant 0 : i32
    %c0_i32_0 = arith.constant 0 : i32
    %c0_i32_1 = arith.constant 0 : i32
    return %c0_i32, %c0_i32_0 : i32, i32
  }
  func.func @transform_5(%arg0: i32) -> (i32, i32) {
    %c0_i32 = arith.constant 0 : i32
    %c0_i32_0 = arith.constant 0 : i32
    %c0_i32_1 = arith.constant 0 : i32
    return %c0_i32, %c0_i32_0 : i32, i32
  }
  func.func @transform_6(%arg0: i32) -> (i32, i32, i32) {
    %c0_i32 = arith.constant 0 : i32
    %c0_i32_0 = arith.constant 0 : i32
    %c0_i32_1 = arith.constant 0 : i32
    %c0_i32_2 = arith.constant 0 : i32
    return %c0_i32, %c0_i32_0, %c0_i32_1 : i32, i32, i32
  }
  func.func @transform_7(%arg0: i32) -> (i32, i32) {
    %c0_i32 = arith.constant 0 : i32
    %c0_i32_0 = arith.constant 0 : i32
    %c0_i32_1 = arith.constant 0 : i32
    return %c0_i32, %c0_i32_0 : i32, i32
  }
}

</mosaic_0001>

<bundles_post_ra>
// kernel: tpu_custom_call.1
= control target key start
LH: loop header
LB: loop body
LE: loop exit
PB: predicated region body
PF: predicated region fallthrough
CT: control target
= control target key end

     0   :  { %13 = vsyncpa [#allocation3], 0  ;;  %s2294_s0 = inlined_call_operand.vmem [shape: f32[64,4], index: 0, kind: input, shape index: {}]   ;;  %s2295_s1 = inlined_call_operand.vmem [shape: f32[64,64], index: 1, kind: input, shape index: {}]   ;;  %s2296_s2 = inlined_call_operand.hbm [shape: f32[4,256], index: 2, kind: input, shape index: {}]   ;;  %s2297_s3 = inlined_call_operand.hbm [shape: f32[64,256], index: 3, kind: input, shape index: {}]   ;;  %s2298_s4 = inlined_call_operand.hbm [shape: f32[64,256], index: 4, kind: input, shape index: {}]   ;;  %s2299_s5 = inlined_call_operand.vmem [shape: f32[1,256], index: 5, kind: input, shape index: {}]   ;;  %s2300_s6 = inlined_call_operand.hbm [shape: f32[8,8,64], index: 6, kind: output, shape index: {0}]   ;;  %s2301_s7 = inlined_call_operand.hbm [shape: f32[8,64], index: 7, kind: output, shape index: {1}]  }
   0x1   :  { %14 = vsyncpa [#allocation6], 0 }
   0x2   :  { %15 = vsyncpa [#allocation4], 0 }
   0x3   :  { %16 = vsyncpa [#allocation10], 0  ;;  %s1759_s24 = smov [#allocation5]  }
   0x4   :  { %s36_s25 = sshll.u32 %s1759_s24, 4  ;;  %s37_s25 = int_to_ptr.vmem [resolvable:$true] %s36_s25 }
   0x5   :  { %s1659_s26 = scalar_lea.vmem %s37_s25, 2048  ;;  %p1664_p1 = scmp.lt.s32.totalorder %s37_s25, %s37_s25 }
   0x6   :  { %p1660_p0 = scmp.ne.s32.totalorder %s37_s25, %s1659_s26  ;;  %p1665_p2 = scmp.lt.s32.totalorder %s1659_s26, %s1659_s26 }
   0x8   :  { %p1666_p3 = por %p1665_p2, %p1664_p1 }
   0xa   :  { %p1667_p4 = pnand %p1666_p3, %p1660_p0 }
   0xc   :  { %1670 = shalt.err (!%p1667_p4)
}
   0xd   :  { %s1760_s27 = smov 256   ;;  %s1761_s28 = smov 16  }
   0xe   :  { %42 = dma.hbm_to_vmem [thread:$0]  %s2297_s3, 2048, %s37_s25, [#allocation6], %s1760_s27, %s1760_s27, %s1761_s28  }
   0xf   :  { %s1762_s8 = smov [#allocation2]   ;;  %s1763_s10 = smov [#allocation7]  }
  0x10   :  { %s27_s9 = sshll.u32 %s1762_s8, 4  ;;  %s48_s11 = sshll.u32 %s1763_s10, 4  ;;  %s28_s9 = int_to_ptr.vmem [resolvable:$true] %s27_s9  ;;  %s49_s11 = int_to_ptr.vmem [resolvable:$true] %s48_s11 }
  0x11   :  { %s1679_s12 = scalar_lea.vmem %s28_s9, 128  ;;  %p1684_p6 = scmp.lt.s32.totalorder %s28_s9, %s28_s9 }
  0x12   :  { %p1680_p5 = scmp.ne.s32.totalorder %s28_s9, %s1679_s12  ;;  %p1685_p7 = scmp.lt.s32.totalorder %s1679_s12, %s1679_s12 }
  0x14   :  { %p1686_p8 = por %p1685_p7, %p1684_p6 }
  0x16   :  { %p1687_p9 = pnand %p1686_p8, %p1680_p5 }
  0x18   :  { %1690 = shalt.err (!%p1687_p9)
}
  0x19   :  { %30 = dma.hbm_to_vmem [thread:$0]  %s2296_s2, 128, %s28_s9, [#allocation3]  }
  0x1a   :  { %s1699_s15 = scalar_lea.vmem %s49_s11, 2048  ;;  %p1704_p11 = scmp.lt.s32.totalorder %s49_s11, %s49_s11 }
  0x1b   :  { %p1700_p10 = scmp.ne.s32.totalorder %s49_s11, %s1699_s15  ;;  %p1705_p12 = scmp.lt.s32.totalorder %s1699_s15, %s1699_s15 }
  0x1d   :  { %p1706_p13 = por %p1705_p12, %p1704_p11 }
  0x1f   :  { %p1707_p0 = pnand %p1706_p13, %p1700_p10 }
  0x21   :  { %1710 = shalt.err (!%p1707_p0)
}
  0x22   :  { %54 = dma.hbm_to_vmem [thread:$0]  %s2298_s4, 2048, %s49_s11, [#allocation6], %s1760_s27, %s1760_s27, %s1761_s28  }
  0x23   :  { %1751 = dma.done.wait [#allocation3], 128  }
  0x24   :  { %1752 = vsyncadd [#allocation3], 4294967168 }
  0x25   :  { %1753 = dma.done.wait [#allocation6], 4096  }
  0x26   :  { %1754 = vsyncadd [#allocation6], 4294963200  ;;  %v2302_v0 = vmov 0.0   ;;  %v1765_v1 = vmov 0   ;;  %v2306_v2 = vmov 2   ;;  %v89_v3 = vld [vmem:[#allocation5 + $0x78] sm:$0xff]  ;;  %v92_v40 = vlaneseq }
  0x27   :  { %191 = vmatprep.mubr.f32.mxu0 %v2302_v0  ;;  %669 = vmatprep.mubr.f32.mxu1 %v2302_v0  ;;  %v88_v4 = vld [vmem:[#allocation5 + $0x70] sm:$0xff]  ;;  %v87_v5 = vld [vmem:[#allocation5 + $0x68] sm:$0xff]  ;;  %v86_v6 = vld [vmem:[#allocation5 + $0x60] sm:$0xff]  ;;  %vm102_vm0 = vcmask 523264   ;;  %v2304_v37 = vmov 1   ;;  %v1768_v38 = vmov 3  }
  0x28   :  { %1509 = vset.pattern.permute.xlu0 %v1765_v1  ;;  %1511 = vset.pattern.permute.xlu1 %v2306_v2  ;;  %v85_v7 = vld [vmem:[#allocation5 + $0x58] sm:$0xff]  ;;  %v84_v8 = vld [vmem:[#allocation5 + $0x50] sm:$0xff]  ;;  %v83_v11 = vld [vmem:[#allocation5 + $0x48] sm:$0xff]  ;;  %v93_v41 = vshrl.u32 %v92_v40, 7 }
  0x29   :  { %143 = vmatprep.subr.mxu0 %v89_v3  ;;  %v1827_v9 = vld [vmem:[#allocation7 + $0x78] sm:$0xff]  ;;  %v1829_v10 = vld [vmem:[#allocation7 + $0x70] sm:$0xff]  ;;  %v1832_v12 = vld [vmem:[#allocation7 + $0x68] sm:$0xff] }
  0x2a   :  { %144 = vmatpush1.msra.mxu0 %v88_v4  ;;  %621 = vmatprep.subr.mxu1 %v1827_v9  ;;  %v82_v13 = vld [vmem:[#allocation5 + $0x40] sm:$0xff]  ;;  %v1837_v15 = vld [vmem:[#allocation7 + $0x58] sm:$0xff]  ;;  %v1840_v17 = vld [vmem:[#allocation7 + $0x50] sm:$0xff]  ;;  %v94_v42 = vsub.s32 0, %v93_v41  ;;  %v98_v43 = vsub.s32 1, %v93_v41  ;;  %v456_v46 = vsub.s32 2, %v93_v41 }
  0x2b   :  { %145 = vmatprep.subr.mxu0 %v87_v5  ;;  %622 = vmatpush1.msra.mxu1 %v1829_v10  ;;  %v1835_v14 = vld [vmem:[#allocation7 + $0x60] sm:$0xff]  ;;  %v81_v16 = vld [vmem:[#allocation5 + $0x38] sm:$0xff]  ;;  %v80_v18 = vld [vmem:[#allocation5 + $0x30] sm:$0xff]  ;;  %v538_v49 = vsub.s32 3, %v93_v41  ;;  %v296_v51 = vsub.s32 4, %v93_v41  ;;  %v378_v62 = vsub.s32 5, %v93_v41 }
  0x2c   :  { %146 = vmatpush1.msra.mxu0 %v86_v6  ;;  %623 = vmatprep.subr.mxu1 %v1832_v12  ;;  %v1843_v19 = vld [vmem:[#allocation7 + $0x48] sm:$0xff]  ;;  %v1846_v21 = vld [vmem:[#allocation7 + $0x40] sm:$0xff]  ;;  %v1849_v23 = vld [vmem:[#allocation7 + $0x38] sm:$0xff] }
  0x2d   :  { %147 = vmatprep.subr.mxu0 %v85_v7  ;;  %624 = vmatpush1.msra.mxu1 %v1835_v14  ;;  %v79_v20 = vld [vmem:[#allocation5 + $0x28] sm:$0xff]  ;;  %v78_v22 = vld [vmem:[#allocation5 + $0x20] sm:$0xff]  ;;  %v77_v24 = vld [vmem:[#allocation5 + $0x18] sm:$0xff] }
  0x2e   :  { %148 = vmatpush1.msra.mxu0 %v84_v8  ;;  %625 = vmatprep.subr.mxu1 %v1837_v15  ;;  %v1852_v25 = vld [vmem:[#allocation7 + $0x30] sm:$0xff]  ;;  %v1855_v27 = vld [vmem:[#allocation7 + $0x28] sm:$0xff]  ;;  %v1858_v29 = vld [vmem:[#allocation7 + $0x20] sm:$0xff] }
  0x2f   :  { %149 = vmatprep.subr.mxu0 %v83_v11  ;;  %626 = vmatpush1.msra.mxu1 %v1840_v17  ;;  %v76_v26 = vld [vmem:[#allocation5 + $0x10] sm:$0xff]  ;;  %v75_v28 = vld [vmem:[#allocation5 + $0x8] sm:$0xff]  ;;  %v74_v30 = vld [vmem:[#allocation5] sm:$0xff] }
  0x30   :  { %150 = vmatpush1.msra.mxu0 %v82_v13  ;;  %627 = vmatprep.subr.mxu1 %v1843_v19  ;;  %v1861_v31 = vld [vmem:[#allocation7 + $0x18] sm:$0xff]  ;;  %v1867_v33 = vld [vmem:[#allocation7 + $0x10] sm:$0xff]  ;;  %v1870_v34 = vld [vmem:[#allocation7 + $0x8] sm:$0xff] }
  0x31   :  { %151 = vmatprep.subr.mxu0 %v81_v16  ;;  %628 = vmatpush1.msra.mxu1 %v1846_v21  ;;  %v66_v32 = vld [vmem:[%s2295_s1] sm:$0xff]  ;;  %v1876_v36 = vld [vmem:[#allocation7] sm:$0xff]  ;;  %v460_v16 = vsub.s32 6, %v93_v41 }
  0x32   :  { %152 = vmatpush1.msra.mxu0 %v80_v18  ;;  %629 = vmatprep.subr.mxu1 %v1849_v23  ;;  %v240_v35 = vld [vmem:[%s2294_s0] sm:$0xff]  ;;  %v67_v39 = vld [vmem:[%s2295_s1 + $0x8] sm:$0xff] }
  0x33   :  { %153 = vmatprep.subr.mxu0 %v79_v20  ;;  %630 = vmatpush1.msra.mxu1 %v1852_v25  ;;  %v248_v44 = vld [vmem:[#allocation2] sm:$0xff] }
  0x34   :  { %154 = vmatpush1.msra.mxu0 %v78_v22  ;;  %631 = vmatprep.subr.mxu1 %v1855_v27  ;;  %v293_v47 = vrot.slane %v248_v44, %v94_v42  ;;  %v375_v48 = vrot.slane %v248_v44, %v98_v43  ;;  %v90_v50 = vld [vmem:[%s2299_s5] sm:$0x3]  ;;  %v457_v52 = vrot.slane %v248_v44, %v456_v46  ;;  %s1769_s5 = smov 64  }
  0x35   :  { %155 = vmatprep.subr.mxu0 %v77_v24  ;;  %632 = vmatpush1.msra.mxu1 %v1858_v29  ;;  %v1932_v55 = vrot.slane %v90_v50, %v94_v42  ;;  %v539_v57 = vrot.slane %v248_v44, %v538_v49  ;;  %v297_v59 = vrot.slane %v248_v44, %v296_v51 }
  0x36   :  { %156 = vmatpush1.msra.mxu0 %v76_v26  ;;  %633 = vmatprep.subr.mxu1 %v1861_v31  ;;  %v1930_v54 = vrot.slane %v293_v47, %v94_v42  ;;  %v1934_v56 = vrot.slane %v375_v48, %v98_v43  ;;  %v1936_v61 = vrot.slane %v457_v52, %v456_v46 }
  0x37   :  { %157 = vmatprep.subr.mxu0 %v75_v28  ;;  %634 = vmatpush1.msra.mxu1 %v1867_v33  ;;  %v1941_v5 = vrot.slane %v539_v57, %v538_v49  ;;  %v1943_v6 = vrot.slane %v90_v50, %v98_v43  ;;  %v1945_v13 = vrot.slane %v297_v59, %v94_v42 }
  0x38   :  { %158 = vmatpush1.msra.mxu0 %v74_v30  ;;  %635 = vmatprep.subr.mxu1 %v1870_v34  ;;  %v379_v18 = vrot.slane %v248_v44, %v378_v62 }
  0x39   :  { %1463 = vmatmul.mubr.msk.f32.vlgmr.msra.gmra.mxu0 %vm102_vm0, %v66_v32  ;;  %251 = vperm.xlu0 %1509, %v240_v35   ;;  %v461_v32 = vrot.slane %v248_v44, %v460_v16 }
  0x3a   :  { %636 = vmatpush1.msra.mxu1 %v1876_v36  ;;  %423 = vperm.xlu1 %1511, %v240_v35  }
  0x3b   :  { %670 = vmatmul.mubr.f32.vlgmr.msra.gmra.mxu1 %v2302_v0  ;;  %197 = vmatprep.mubr.f32.mxu0 %v2302_v0  ;;  %v1953_v50 = vrot.slane %v461_v32, %v456_v46 }
  0x3c   :  { %723 = vmatprep.subr.mxu1 %v1827_v9  ;;  %771 = vmatprep.mubr.f32.mxu1 %v2302_v0 }
  0x3d   :  { %1510 = vset.pattern.permute.xlu0 %v2304_v37  ;;  %724 = vmatpush1.msra.mxu1 %v1829_v10 }
  0x3e   :  { %341 = vperm.xlu0 %1510, %v240_v35   ;;  %1512 = vset.pattern.permute.xlu1 %v1768_v38 }
  0x3f   :  { %505 = vperm.xlu1 %1512, %v240_v35   ;;  %725 = vmatprep.subr.mxu1 %v1832_v12  ;;  %v1951_v35 = vrot.slane %v379_v18, %v98_v43 }
  0x40   :  { %726 = vmatpush1.msra.mxu1 %v1835_v14  ;;  %826 = vmatprep.subr.mxu0 %v1827_v9 }
  0x41   :  { %727 = vmatprep.subr.mxu1 %v1837_v15  ;;  %827 = vmatpush1.msra.mxu0 %v1829_v10 }
  0x42   :  { %728 = vmatpush1.msra.mxu1 %v1840_v17  ;;  %828 = vmatprep.subr.mxu0 %v1832_v12 }
  0x43   :  { %1513 = vset.pattern.permute.xlu1 %v1765_v1  ;;  %729 = vmatprep.subr.mxu1 %v1843_v19 }
  0x44   :  { %730 = vmatpush1.msra.mxu1 %v1846_v21  ;;  %829 = vmatpush1.msra.mxu0 %v1835_v14 }
  0x45   :  { %731 = vmatprep.subr.mxu1 %v1849_v23  ;;  %830 = vmatprep.subr.mxu0 %v1837_v15 }
  0x46   :  { %732 = vmatpush1.msra.mxu1 %v1852_v25  ;;  %831 = vmatpush1.msra.mxu0 %v1840_v17 }
  0x47   :  { %733 = vmatprep.subr.mxu1 %v1855_v27  ;;  %832 = vmatprep.subr.mxu0 %v1843_v19 }
  0x48   :  { %734 = vmatpush1.msra.mxu1 %v1858_v29  ;;  %833 = vmatpush1.msra.mxu0 %v1846_v21 }
  0x49   :  { %735 = vmatprep.subr.mxu1 %v1861_v31  ;;  %834 = vmatprep.subr.mxu0 %v1849_v23 }
  0x4a   :  { %736 = vmatpush1.msra.mxu1 %v1867_v33  ;;  %835 = vmatpush1.msra.mxu0 %v1852_v25 }
  0x4b   :  { %737 = vmatprep.subr.mxu1 %v1870_v34  ;;  %836 = vmatprep.subr.mxu0 %v1855_v27 }
  0x4c   :  { %738 = vmatpush1.msra.mxu1 %v1876_v36  ;;  %837 = vmatpush1.msra.mxu0 %v1858_v29 }
  0x4d   :  { %838 = vmatprep.subr.mxu0 %v1861_v31  ;;  %929 = vmatprep.subr.mxu1 %v1827_v9 }
  0x4e   :  { %839 = vmatpush1.msra.mxu0 %v1867_v33 }
  0x4f   :  { %840 = vmatprep.subr.mxu0 %v1870_v34  ;;  %1464 = vmatmul.mubr.msk.f32.gmra.mxu0 %vm102_vm0, %v67_v39  ;;  %v542_v39 = vsub.s32 7, %v93_v41 }
  0x50   :  { %841 = vmatpush1.msra.mxu0 %v1876_v36  ;;  %203 = vmatprep.mubr.f32.mxu0 %v2302_v0 }
  0x51   :  { %1032 = vmatprep.subr.mxu0 %v1827_v9  ;;  %v543_v52 = vrot.slane %v248_v44, %v542_v39 }
  0x53   :  { %v1957_v62 = vrot.slane %v543_v52, %v538_v49  ;;  %v241_v49 = vld [vmem:[%s2294_s0 + $0x8] sm:$0xff] }
  0xb4   :  { %v252_v45 = vpop.permute.xlu0 %251 }
  0xb5   :  { %v424_v53 = vpop.permute.xlu1 %423  ;;  %v308_v63 = vmul.f32 %v1930_v54, %v252_v45  ;;  %v309_v30 = vmul.f32 %v1945_v13, %v252_v45 }
  0xb6   :  { %v472_v20 = vmul.f32 %v1936_v61, %v424_v53 }
  0xb9   :  { %v342_v58 = vpop.permute.xlu0 %341 }
  0xba   :  { %v390_v4 = vmul.f32 %v1934_v56, %v342_v58  ;;  %v506_v7 = vpop.permute.xlu1 %505  ;;  %v391_v51 = vmul.f32 %v1951_v35, %v342_v58 }
  0xbb   :  { %v554_v24 = vmul.f32 %v1941_v5, %v506_v7  ;;  %v555_v43 = vmul.f32 %v1957_v62, %v506_v7 }
  0xf9   :  { %v193_v60 = vpop.f32.mrf.mxu0 }
  0xfa   :  { %v194_v3 = vadd.f32 %v193_v60, %v1932_v55  ;;  %v473_v60 = vmul.f32 %v1953_v50, %v424_v53 }
  0xfb   :  { %v195_v11 = vpop.f32.mrf.mxu0  ;;  %v671_v42 = vpop.f32.mrf.mxu1 }
  0xfc   :  { %v324_v8 = vadd.f32 %v308_v63, %v194_v3  ;;  %v196_v26 = vadd.f32 %v195_v11, %v1943_v6 }
  0xfd   :  { %v673_v63 = vpop.f32.mrf.mxu1 }
  0xfe   :  { %v406_v22 = vadd.f32 %v390_v4, %v324_v8  ;;  %v325_v47 = vadd.f32 %v309_v30, %v196_v26 }
 0x100   :  { %v488_v28 = vadd.f32 %v472_v20, %v406_v22  ;;  %v407_v59 = vadd.f32 %v391_v51, %v325_v47 }
 0x102   :  { %v570_v40 = vadd.f32 %v554_v24, %v488_v28  ;;  %v489_v45 = vadd.f32 %v473_v60, %v407_v59 }
 0x104   :  { %v676_v48 = vadd.f32 %v671_v42, %v570_v40  ;;  %v571_v41 = vadd.f32 %v555_v43, %v489_v45 }
 0x106   :  { %v1471_v57 = vmul.f32 -1.442695, %v676_v48  ;;  %v677_v3 = vadd.f32 %v673_v63, %v571_v41 }
 0x108   :  { %1540 = vpow2.f32 %v1471_v57  ;;  %v1472_v53 = vmul.f32 -1.442695, %v677_v3 }
 0x109   :  { %1542 = vtanh.f32 %v677_v3 }
 0x10f   :  { %v199_v32 = vpop.f32.mrf.mxu0 }
 0x110   :  { %v200_v39 = vadd.f32 %v199_v32, %v1932_v55 }
 0x111   :  { %v201_v60 = vpop.f32.mrf.mxu0 }
 0x112   :  { %v202_v41 = vadd.f32 %v201_v60, %v1943_v6 }
 0x115   :  { %v1541_v4 = vpop.eup %1540 }
 0x116   :  { %v684_v8 = vadd.f32 1.0, %v1541_v4  ;;  %v1543_v46 = vpop.eup %1542 }
 0x118   :  { %1544 = vrcp.f32 %v684_v8 }
 0x119   :  { %1546 = vpow2.f32 %v1472_v53 }
 0x125   :  { %v1545_v58 = vpop.eup %1544 }
 0x126   :  { %v692_v44 = vmul.f32 %v1545_v58, %v1543_v46  ;;  %v1547_v7 = vpop.eup %1546  ;;  %v691_v16 = vmul.f32 0.0, %v1545_v58 }
 0x127   :  { %v685_v11 = vadd.f32 1.0, %v1547_v7 }
 0x128   :  { %694 = vrot.lane.b32.xlu1 %v692_v44, %s1769_s5 }
 0x129   :  { %1548 = vrcp.f32 %v685_v11 }
 0x12c   :  { %256 = vperm.xlu1 %1513, %v241_v49  }
 0x130   :  { %1514 = vset.pattern.permute.xlu1 %v2306_v2 }
 0x131   :  { %427 = vperm.xlu1 %1514, %v241_v49  }
 0x135   :  { %1517 = vset.pattern.permute.xlu1 %v2304_v37 }
 0x136   :  { %v1549_v22 = vpop.eup %1548 }
 0x19a   :  { %v695_v18 = vpop.permute.xlu1 %694 }
 0x19b   :  { %v1966_v20 = vadd.f32 %v695_v18, %v691_v16 }
 0x19d   :  { %1550 = vtanh.f32 %v1966_v20 }
 0x1a7   :  { %v257_v30 = vpop.permute.xlu1 %256 }
 0x1a8   :  { %v310_v40 = vmul.f32 %v1930_v54, %v257_v30  ;;  %v311_v63 = vmul.f32 %v1945_v13, %v257_v30 }
 0x1aa   :  { %v1551_v24 = vpop.eup %1550  ;;  %v326_v42 = vadd.f32 %v310_v40, %v200_v39  ;;  %v327_v46 = vadd.f32 %v311_v63, %v202_v41  ;;  %v68_v39 = vld [vmem:[%s2295_s1 + $0x10] sm:$0xff]  ;;  %v69_v40 = vld [vmem:[%s2295_s1 + $0x18] sm:$0xff] }
 0x1ab   :  { %v699_v26 = vmul.f32 %v1551_v24, %v1549_v22  ;;  %1465 = vmatmul.mubr.msk.f32.gmra.mxu0 %vm102_vm0, %v68_v39  ;;  %v242_v41 = vld [vmem:[%s2294_s0 + $0x10] sm:$0xff]  ;;  %v2043_v63 = vld [vmem:[%s2294_s0 + $0x18] sm:$0xff] }
 0x1ac   :  { %v428_v51 = vpop.permute.xlu1 %427  ;;  %209 = vmatprep.mubr.f32.mxu0 %v2302_v0 }
 0x1ad   :  { %701 = vrot.lane.b32.xlu0 %v699_v26, %s1769_s5  ;;  %v474_v57 = vmul.f32 %v1936_v61, %v428_v51  ;;  %v475_v53 = vmul.f32 %v1953_v50, %v428_v51  ;;  %v73_v51 = vld [vmem:[%s2295_s1 + $0x38] sm:$0xff] }
 0x1af   :  { %1466 = vmatmul.mubr.msk.f32.gmra.mxu0 %vm102_vm0, %v69_v40 }
 0x1b0   :  { %215 = vmatprep.mubr.f32.mxu0 %v2302_v0 }
 0x1b1   :  { %345 = vperm.xlu0 %1510, %v241_v49  }
 0x1b5   :  { %1515 = vset.pattern.permute.xlu0 %v1768_v38 }
 0x1b6   :  { %509 = vperm.xlu0 %1515, %v241_v49  }
 0x1ba   :  { %1516 = vset.pattern.permute.xlu0 %v1765_v1 }
 0x1bb   :  { %261 = vperm.xlu0 %1516, %v242_v41  }
 0x1bf   :  { %1519 = vset.pattern.permute.xlu0 %v1768_v38 }
 0x1c0   :  { %513 = vperm.xlu0 %1519, %v242_v41  }
 0x1c4   :  { %1520 = vset.pattern.permute.xlu0 %v1765_v1 }
 0x1c5   :  { %266 = vperm.xlu0 %1520, %v2043_v63  }
 0x1c9   :  { %1523 = vset.pattern.permute.xlu0 %v1768_v38 }
 0x1ca   :  { %517 = vperm.xlu0 %1523, %v2043_v63  }
 0x1ce   :  { %1524 = vset.pattern.permute.xlu0 %v1765_v1 }
 0x21f   :  { %v702_v28 = vpop.permute.xlu0 %701 }
 0x220   :  { %704 = vst.msk [vmem:[#allocation8] sm:$0xff] %vm102_vm0, %v702_v28  ;;  %1473 = vmatmul.mubr.msk.f32.vlgmr.msra.gmra.mxu1 %vm102_vm0, %v702_v28 }
 0x221   :  { %930 = vmatpush1.msra.mxu1 %v1829_v10  ;;  %977 = vmatprep.mubr.f32.mxu1 %v2302_v0 }
 0x222   :  { %931 = vmatprep.subr.mxu1 %v1832_v12 }
 0x223   :  { %932 = vmatpush1.msra.mxu1 %v1835_v14 }
 0x224   :  { %933 = vmatprep.subr.mxu1 %v1837_v15 }
 0x225   :  { %934 = vmatpush1.msra.mxu1 %v1840_v17 }
 0x226   :  { %935 = vmatprep.subr.mxu1 %v1843_v19 }
 0x227   :  { %936 = vmatpush1.msra.mxu1 %v1846_v21 }
 0x228   :  { %937 = vmatprep.subr.mxu1 %v1849_v23 }
 0x229   :  { %938 = vmatpush1.msra.mxu1 %v1852_v25 }
 0x22a   :  { %939 = vmatprep.subr.mxu1 %v1855_v27 }
 0x22b   :  { %940 = vmatpush1.msra.mxu1 %v1858_v29 }
 0x22c   :  { %941 = vmatprep.subr.mxu1 %v1861_v31  ;;  %v346_v47 = vpop.permute.xlu0 %345 }
 0x22d   :  { %942 = vmatpush1.msra.mxu1 %v1867_v33  ;;  %v392_v48 = vmul.f32 %v1934_v56, %v346_v47  ;;  %v393_v58 = vmul.f32 %v1951_v35, %v346_v47  ;;  %v70_v47 = vld [vmem:[%s2295_s1 + $0x20] sm:$0xff] }
 0x22e   :  { %943 = vmatprep.subr.mxu1 %v1870_v34  ;;  %1467 = vmatmul.mubr.msk.f32.gmra.mxu0 %vm102_vm0, %v70_v47 }
 0x22f   :  { %944 = vmatpush1.msra.mxu1 %v1876_v36  ;;  %v408_v52 = vadd.f32 %v392_v48, %v326_v42  ;;  %v409_v49 = vadd.f32 %v393_v58, %v327_v46  ;;  %221 = vmatprep.mubr.f32.mxu0 %v2302_v0  ;;  %v71_v42 = vld [vmem:[%s2295_s1 + $0x28] sm:$0xff]  ;;  %v72_v48 = vld [vmem:[%s2295_s1 + $0x30] sm:$0xff] }
 0x230   :  { %1135 = vmatprep.subr.mxu1 %v1827_v9  ;;  %v2064_v46 = vld [vmem:[%s2294_s0 + $0x28] sm:$0xff]  ;;  %v2073_v58 = vld [vmem:[%s2294_s0 + $0x30] sm:$0xff] }
 0x231   :  { %v510_v59 = vpop.permute.xlu0 %509  ;;  %v490_v45 = vadd.f32 %v474_v57, %v408_v52  ;;  %v491_v7 = vadd.f32 %v475_v53, %v409_v49 }
 0x232   :  { %v556_v43 = vmul.f32 %v1941_v5, %v510_v59  ;;  %v557_v11 = vmul.f32 %v1957_v62, %v510_v59  ;;  %1468 = vmatmul.mubr.msk.f32.gmra.mxu0 %vm102_vm0, %v71_v42 }
 0x233   :  { %227 = vmatprep.mubr.f32.mxu0 %v2302_v0 }
 0x234   :  { %v572_v3 = vadd.f32 %v556_v43, %v490_v45  ;;  %v573_v18 = vadd.f32 %v557_v11, %v491_v7 }
 0x236   :  { %1469 = vmatmul.mubr.msk.f32.gmra.mxu0 %vm102_vm0, %v72_v48 }
 0x237   :  { %233 = vmatprep.mubr.f32.mxu0 %v2302_v0 }
 0x23a   :  { %1470 = vmatmul.mubr.msk.f32.gmra.mxu0 %vm102_vm0, %v73_v51 }
 0x23b   :  { %874 = vmatprep.mubr.f32.mxu0 %v2302_v0 }
 0x2e0   :  { %v773_v4 = vpop.f32.mrf.mxu1 }
 0x2e1   :  { %v778_v8 = vadd.f32 %v773_v4, %v572_v3 }
 0x2e2   :  { %v775_v16 = vpop.f32.mrf.mxu1 }
 0x2e3   :  { %v1474_v44 = vmul.f32 -1.442695, %v778_v8  ;;  %v779_v22 = vadd.f32 %v775_v16, %v573_v18  ;;  %v2053_v8 = vld [vmem:[%s2294_s0 + $0x20] sm:$0xff] }
 0x2e4   :  { %271 = vperm.xlu0 %1524, %v2053_v8  }
 0x2e5   :  { %1552 = vpow2.f32 %v1474_v44  ;;  %v1475_v52 = vmul.f32 -1.442695, %v779_v22  ;;  %v2082_v44 = vld [vmem:[%s2294_s0 + $0x38] sm:$0xff]  ;;  %s1770_s0 = smov [#allocation9]  }
 0x2e6   :  { %1554 = vtanh.f32 %v779_v22  ;;  %s1449_s22 = sshll.u32 %s1770_s0, 4  ;;  %s1450_s22 = int_to_ptr.vmem [resolvable:$true] %s1449_s22 }
 0x2e7   :  { %s1711_s23 = scalar_lea.vmem %s1450_s22, 128  ;;  %p1716_p2 = scmp.lt.s32.totalorder %s1450_s22, %s1450_s22 }
 0x2e8   :  { %1527 = vset.pattern.permute.xlu0 %v1768_v38  ;;  %p1712_p1 = scmp.ne.s32.totalorder %s1450_s22, %s1711_s23  ;;  %p1717_p3 = scmp.lt.s32.totalorder %s1711_s23, %s1711_s23 }
 0x2e9   :  { %521 = vperm.xlu0 %1527, %v2053_v8  }
 0x2ea   :  { %p1718_p4 = por %p1717_p3, %p1716_p2 }
 0x2ec   :  { %p1719_p5 = pnand %p1718_p4, %p1712_p1 }
 0x2ed   :  { %1528 = vset.pattern.permute.xlu0 %v1765_v1 }
 0x2ee   :  { %276 = vperm.xlu0 %1528, %v2064_v46  }
 0x2f2   :  { %v1553_v24 = vpop.eup %1552  ;;  %1531 = vset.pattern.permute.xlu0 %v1768_v38 }
 0x2f3   :  { %v786_v26 = vadd.f32 1.0, %v1553_v24  ;;  %v1555_v28 = vpop.eup %1554  ;;  %525 = vperm.xlu0 %1531, %v2064_v46   ;;  %v262_v24 = vpop.permute.xlu0 %261 }
 0x2f5   :  { %1556 = vrcp.f32 %v786_v26 }
 0x2f6   :  { %1558 = vpow2.f32 %v1475_v52 }
 0x2f7   :  { %1532 = vset.pattern.permute.xlu0 %v1765_v1  ;;  %v514_v52 = vpop.permute.xlu0 %513 }
 0x2f8   :  { %281 = vperm.xlu0 %1532, %v2073_v58  }
 0x2fc   :  { %1535 = vset.pattern.permute.xlu0 %v1768_v38 }
 0x2fd   :  { %529 = vperm.xlu0 %1535, %v2073_v58  }
 0x301   :  { %1536 = vset.pattern.permute.xlu0 %v1765_v1  ;;  %v205_v1 = vpop.f32.mrf.mxu0 }
 0x302   :  { %v1557_v30 = vpop.eup %1556  ;;  %286 = vperm.xlu0 %1536, %v2082_v44  }
 0x303   :  { %v794_v32 = vmul.f32 %v1557_v30, %v1555_v28  ;;  %v1559_v57 = vpop.eup %1558  ;;  %v793_v60 = vmul.f32 %v1557_v30, %v1966_v20  ;;  %v312_v28 = vmul.f32 %v1930_v54, %v262_v24  ;;  %v206_v30 = vadd.f32 %v205_v1, %v1932_v55 }
 0x304   :  { %v787_v59 = vadd.f32 1.0, %v1559_v57 }
 0x305   :  { %796 = vrot.lane.b32.xlu1 %v794_v32, %s1769_s5  ;;  %v328_v39 = vadd.f32 %v312_v28, %v206_v30 }
 0x306   :  { %1560 = vrcp.f32 %v787_v59  ;;  %1539 = vset.pattern.permute.xlu0 %v1768_v38  ;;  %v207_v38 = vpop.f32.mrf.mxu0  ;;  %v558_v59 = vmul.f32 %v1941_v5, %v514_v52 }
 0x307   :  { %533 = vperm.xlu0 %1539, %v2082_v44  }
 0x308   :  { %v2107_v53 = vpop.f32.mrf.mxu0 }
 0x30a   :  { %v2109_v7 = vpop.f32.mrf.mxu0 }
 0x30c   :  { %v2111_v11 = vpop.f32.mrf.mxu0 }
 0x30e   :  { %v2113_v16 = vpop.f32.mrf.mxu0 }
 0x310   :  { %v2115_v18 = vpop.f32.mrf.mxu0 }
 0x312   :  { %v2117_v22 = vpop.f32.mrf.mxu0 }
 0x313   :  { %v1561_v20 = vpop.eup %1560 }
 0x314   :  { %v2121_v32 = vpop.f32.mrf.mxu0 }
 0x316   :  { %v2124_v42 = vpop.f32.mrf.mxu0 }
 0x318   :  { %v2127_v57 = vpop.f32.mrf.mxu0 }
 0x377   :  { %v797_v45 = vpop.permute.xlu1 %796 }
 0x378   :  { %v2033_v43 = vadd.f32 %v797_v45, %v793_v60  ;;  %v313_v45 = vmul.f32 %v1945_v13, %v262_v24 }
 0x37a   :  { %1562 = vtanh.f32 %v2033_v43 }
 0x387   :  { %v1563_v3 = vpop.eup %1562 }
 0x388   :  { %v801_v4 = vmul.f32 %v1563_v3, %v1561_v20  ;;  %v2132_v20 = vpop.f32.mrf.mxu0 }
 0x38a   :  { %803 = vrot.lane.b32.xlu1 %v801_v4, %s1769_s5 }
 0x38e   :  { %349 = vperm.xlu1 %1517, %v242_v41  }
 0x392   :  { %1518 = vset.pattern.permute.xlu1 %v2306_v2 }
 0x393   :  { %431 = vperm.xlu1 %1518, %v242_v41   ;;  %v208_v41 = vadd.f32 %v207_v38, %v1943_v6 }
 0x395   :  { %v329_v1 = vadd.f32 %v313_v45, %v208_v41 }
 0x397   :  { %1521 = vset.pattern.permute.xlu1 %v2304_v37 }
 0x3fc   :  { %v804_v49 = vpop.permute.xlu1 %803 }
 0x3fd   :  { %807 = vst.msk [vmem:[#allocation8 + $0x8] sm:$0xff] %vm102_vm0, %v804_v49  ;;  %1476 = vmatmul.mubr.msk.f32.vlgmr.msra.gmra.mxu0 %vm102_vm0, %v804_v49 }
 0x3fe   :  { %1033 = vmatpush1.msra.mxu0 %v1829_v10  ;;  %1080 = vmatprep.mubr.f32.mxu0 %v2302_v0  ;;  %v559_v0 = vmul.f32 %v1957_v62, %v514_v52 }
 0x3ff   :  { %1034 = vmatprep.subr.mxu0 %v1832_v12 }
 0x400   :  { %1035 = vmatpush1.msra.mxu0 %v1835_v14 }
 0x401   :  { %1036 = vmatprep.subr.mxu0 %v1837_v15 }
 0x402   :  { %1037 = vmatpush1.msra.mxu0 %v1840_v17 }
 0x403   :  { %1038 = vmatprep.subr.mxu0 %v1843_v19 }
 0x404   :  { %1039 = vmatpush1.msra.mxu0 %v1846_v21 }
 0x405   :  { %1040 = vmatprep.subr.mxu0 %v1849_v23 }
 0x406   :  { %1041 = vmatpush1.msra.mxu0 %v1852_v25 }
 0x407   :  { %1042 = vmatprep.subr.mxu0 %v1855_v27 }
 0x408   :  { %1043 = vmatpush1.msra.mxu0 %v1858_v29 }
 0x409   :  { %1044 = vmatprep.subr.mxu0 %v1861_v31  ;;  %v350_v26 = vpop.permute.xlu1 %349 }
 0x40a   :  { %1045 = vmatpush1.msra.mxu0 %v1867_v33  ;;  %v394_v40 = vmul.f32 %v1934_v56, %v350_v26  ;;  %v395_v28 = vmul.f32 %v1951_v35, %v350_v26 }
 0x40b   :  { %1046 = vmatprep.subr.mxu0 %v1870_v34 }
 0x40c   :  { %1047 = vmatpush1.msra.mxu0 %v1876_v36  ;;  %v410_v48 = vadd.f32 %v394_v40, %v328_v39  ;;  %v411_v39 = vadd.f32 %v395_v28, %v329_v1  ;;  %v2308_v1 = vmov 2   ;;  %v2310_v28 = vmov 0.0  }
 0x40d   :  { %1238 = vmatprep.subr.mxu0 %v1827_v9 }
 0x40e   :  { %v432_v47 = vpop.permute.xlu1 %431 }
 0x40f   :  { %v476_v51 = vmul.f32 %v1936_v61, %v432_v47  ;;  %v477_v40 = vmul.f32 %v1953_v50, %v432_v47 }
 0x411   :  { %v492_v60 = vadd.f32 %v476_v51, %v410_v48  ;;  %v493_v48 = vadd.f32 %v477_v40, %v411_v39  ;;  %v212_v40 = vadd.f32 %v2107_v53, %v1932_v55 }
 0x413   :  { %v574_v3 = vadd.f32 %v558_v59, %v492_v60  ;;  %v575_v24 = vadd.f32 %v559_v0, %v493_v48 }
 0x4bd   :  { %v876_v4 = vpop.f32.mrf.mxu0 }
 0x4be   :  { %v881_v49 = vadd.f32 %v876_v4, %v574_v3 }
 0x4bf   :  { %v878_v51 = vpop.f32.mrf.mxu0 }
 0x4c0   :  { %v1477_v30 = vmul.f32 -1.442695, %v881_v49  ;;  %v882_v37 = vadd.f32 %v878_v51, %v575_v24 }
 0x4c2   :  { %1564 = vpow2.f32 %v1477_v30  ;;  %v1478_v26 = vmul.f32 -1.442695, %v882_v37  ;;  %v267_v30 = vpop.permute.xlu0 %266 }
 0x4c3   :  { %1566 = vtanh.f32 %v882_v37  ;;  %v2309_v37 = vmov 1   ;;  %v314_v39 = vmul.f32 %v1930_v54, %v267_v30 }
 0x4c5   :  { %v330_v24 = vadd.f32 %v314_v39, %v212_v40 }
 0x4cf   :  { %v1565_v38 = vpop.eup %1564 }
 0x4d0   :  { %v889_v2 = vadd.f32 1.0, %v1565_v38  ;;  %v1567_v59 = vpop.eup %1566 }
 0x4d2   :  { %1568 = vrcp.f32 %v889_v2 }
 0x4d3   :  { %1570 = vpow2.f32 %v1478_v26 }
 0x4df   :  { %v1569_v60 = vpop.eup %1568 }
 0x4e0   :  { %v897_v45 = vmul.f32 %v1569_v60, %v1567_v59  ;;  %v1571_v41 = vpop.eup %1570  ;;  %v896_v47 = vmul.f32 %v1569_v60, %v2033_v43  ;;  %v518_v60 = vpop.permute.xlu0 %517 }
 0x4e1   :  { %v890_v3 = vadd.f32 1.0, %v1571_v41  ;;  %v561_v39 = vmul.f32 %v1957_v62, %v518_v60 }
 0x4e2   :  { %899 = vrot.lane.b32.xlu1 %v897_v45, %s1769_s5  ;;  %v560_v45 = vmul.f32 %v1941_v5, %v518_v60 }
 0x4e3   :  { %1572 = vrcp.f32 %v890_v3 }
 0x4f0   :  { %v1573_v0 = vpop.eup %1572 }
 0x554   :  { %v900_v52 = vpop.permute.xlu1 %899 }
 0x555   :  { %v2139_v4 = vadd.f32 %v900_v52, %v896_v47  ;;  %v315_v47 = vmul.f32 %v1945_v13, %v267_v30  ;;  %v214_v52 = vadd.f32 %v2109_v7, %v1943_v6 }
 0x557   :  { %1574 = vtanh.f32 %v2139_v4 }
 0x564   :  { %v1575_v49 = vpop.eup %1574 }
 0x565   :  { %v904_v2 = vmul.f32 %v1575_v49, %v1573_v0  ;;  %v331_v49 = vadd.f32 %v315_v47, %v214_v52 }
 0x567   :  { %906 = vrot.lane.b32.xlu1 %v904_v2, %s1769_s5 }
 0x56b   :  { %353 = vperm.xlu1 %1521, %v2043_v63  }
 0x56f   :  { %1522 = vset.pattern.permute.xlu1 %v2308_v1 }
 0x570   :  { %435 = vperm.xlu1 %1522, %v2043_v63  }
 0x574   :  { %1525 = vset.pattern.permute.xlu1 %v2309_v37 }
 0x5d9   :  { %v907_v43 = vpop.permute.xlu1 %906 }
 0x5da   :  { %910 = vst.msk [vmem:[#allocation8 + $0x10] sm:$0xff] %vm102_vm0, %v907_v43  ;;  %1479 = vmatmul.mubr.msk.f32.vlgmr.msra.gmra.mxu1 %vm102_vm0, %v907_v43 }
 0x5db   :  { %1136 = vmatpush1.msra.mxu1 %v1829_v10  ;;  %1183 = vmatprep.mubr.f32.mxu1 %v2310_v28 }
 0x5dc   :  { %1137 = vmatprep.subr.mxu1 %v1832_v12 }
 0x5dd   :  { %1138 = vmatpush1.msra.mxu1 %v1835_v14 }
 0x5de   :  { %1139 = vmatprep.subr.mxu1 %v1837_v15 }
 0x5df   :  { %1140 = vmatpush1.msra.mxu1 %v1840_v17 }
 0x5e0   :  { %1141 = vmatprep.subr.mxu1 %v1843_v19 }
 0x5e1   :  { %1142 = vmatpush1.msra.mxu1 %v1846_v21 }
 0x5e2   :  { %1143 = vmatprep.subr.mxu1 %v1849_v23 }
 0x5e3   :  { %1144 = vmatpush1.msra.mxu1 %v1852_v25 }
 0x5e4   :  { %1145 = vmatprep.subr.mxu1 %v1855_v27 }
 0x5e5   :  { %1146 = vmatpush1.msra.mxu1 %v1858_v29 }
 0x5e6   :  { %1147 = vmatprep.subr.mxu1 %v1861_v31  ;;  %v354_v63 = vpop.permute.xlu1 %353 }
 0x5e7   :  { %1148 = vmatpush1.msra.mxu1 %v1867_v33  ;;  %v396_v51 = vmul.f32 %v1934_v56, %v354_v63  ;;  %v397_v0 = vmul.f32 %v1951_v35, %v354_v63 }
 0x5e8   :  { %1149 = vmatprep.subr.mxu1 %v1870_v34 }
 0x5e9   :  { %1150 = vmatpush1.msra.mxu1 %v1876_v36  ;;  %v412_v59 = vadd.f32 %v396_v51, %v330_v24  ;;  %v413_v43 = vadd.f32 %v397_v0, %v331_v49  ;;  %v220_v0 = vadd.f32 %v2113_v16, %v1943_v6 }
 0x5ea   :  { %1341 = vmatprep.subr.mxu1 %v1827_v9 }
 0x5eb   :  { %v436_v48 = vpop.permute.xlu1 %435 }
 0x5ec   :  { %v478_v38 = vmul.f32 %v1936_v61, %v436_v48  ;;  %v479_v2 = vmul.f32 %v1953_v50, %v436_v48 }
 0x5ee   :  { %v494_v26 = vadd.f32 %v478_v38, %v412_v59  ;;  %v495_v40 = vadd.f32 %v479_v2, %v413_v43 }
 0x5f0   :  { %v576_v41 = vadd.f32 %v560_v45, %v494_v26  ;;  %v577_v24 = vadd.f32 %v561_v39, %v495_v40 }
 0x69a   :  { %v979_v9 = vpop.f32.mrf.mxu1 }
 0x69b   :  { %v984_v3 = vadd.f32 %v979_v9, %v576_v41 }
 0x69c   :  { %v981_v51 = vpop.f32.mrf.mxu1 }
 0x69d   :  { %v1480_v53 = vmul.f32 -1.442695, %v984_v3  ;;  %v985_v38 = vadd.f32 %v981_v51, %v577_v24 }
 0x69f   :  { %1576 = vpow2.f32 %v1480_v53  ;;  %v1481_v63 = vmul.f32 -1.442695, %v985_v38 }
 0x6a0   :  { %1578 = vtanh.f32 %v985_v38 }
 0x6ac   :  { %v1577_v59 = vpop.eup %1576 }
 0x6ad   :  { %v992_v45 = vadd.f32 1.0, %v1577_v59  ;;  %v1579_v30 = vpop.eup %1578 }
 0x6af   :  { %1580 = vrcp.f32 %v992_v45 }
 0x6b0   :  { %1582 = vpow2.f32 %v1481_v63 }
 0x6bc   :  { %v1581_v7 = vpop.eup %1580 }
 0x6bd   :  { %v1000_v26 = vmul.f32 %v1581_v7, %v1579_v30  ;;  %v1583_v41 = vpop.eup %1582  ;;  %v999_v9 = vmul.f32 %v1581_v7, %v2139_v4 }
 0x6be   :  { %v993_v48 = vadd.f32 1.0, %v1583_v41 }
 0x6bf   :  { %1002 = vrot.lane.b32.xlu1 %v1000_v26, %s1769_s5 }
 0x6c0   :  { %1584 = vrcp.f32 %v993_v48 }
 0x6cd   :  { %v1585_v47 = vpop.eup %1584 }
 0x731   :  { %v1003_v60 = vpop.permute.xlu1 %1002 }
 0x732   :  { %v2180_v3 = vadd.f32 %v1003_v60, %v999_v9 }
 0x734   :  { %1586 = vtanh.f32 %v2180_v3 }
 0x741   :  { %v1587_v52 = vpop.eup %1586 }
 0x742   :  { %v1007_v53 = vmul.f32 %v1587_v52, %v1585_v47 }
 0x744   :  { %1009 = vrot.lane.b32.xlu1 %v1007_v53, %s1769_s5 }
 0x748   :  { %357 = vperm.xlu1 %1525, %v2053_v8  }
 0x74c   :  { %1526 = vset.pattern.permute.xlu1 %v2308_v1 }
 0x74d   :  { %439 = vperm.xlu1 %1526, %v2053_v8  }
 0x751   :  { %1529 = vset.pattern.permute.xlu1 %v2309_v37 }
 0x7b6   :  { %v1010_v4 = vpop.permute.xlu1 %1009 }
 0x7b7   :  { %1013 = vst.msk [vmem:[#allocation8 + $0x18] sm:$0xff] %vm102_vm0, %v1010_v4  ;;  %1482 = vmatmul.mubr.msk.f32.vlgmr.msra.gmra.mxu0 %vm102_vm0, %v1010_v4 }
 0x7b8   :  { %1239 = vmatpush1.msra.mxu0 %v1829_v10  ;;  %1286 = vmatprep.mubr.f32.mxu0 %v2310_v28 }
 0x7b9   :  { %1240 = vmatprep.subr.mxu0 %v1832_v12  ;;  %v272_v12 = vpop.permute.xlu0 %271 }
 0x7ba   :  { %1241 = vmatpush1.msra.mxu0 %v1835_v14  ;;  %v316_v14 = vmul.f32 %v1930_v54, %v272_v12  ;;  %v317_v8 = vmul.f32 %v1945_v13, %v272_v12  ;;  %v1637_v12 = vld [vmem:[#allocation7 + $0x68] sm:$0xff] }
 0x7bb   :  { %1242 = vmatprep.subr.mxu0 %v1837_v15  ;;  %v218_v15 = vadd.f32 %v2111_v11, %v1932_v55 }
 0x7bc   :  { %1243 = vmatpush1.msra.mxu0 %v1840_v17  ;;  %v333_v2 = vadd.f32 %v317_v8, %v220_v0  ;;  %v224_v0 = vadd.f32 %v2115_v18, %v1932_v55 }
 0x7bd   :  { %1244 = vmatprep.subr.mxu0 %v1843_v19 }
 0x7be   :  { %1245 = vmatpush1.msra.mxu0 %v1846_v21  ;;  %v332_v21 = vadd.f32 %v316_v14, %v218_v15  ;;  %v1638_v14 = vld [vmem:[#allocation7 + $0x60] sm:$0xff]  ;;  %v1639_v15 = vld [vmem:[#allocation7 + $0x58] sm:$0xff] }
 0x7bf   :  { %1246 = vmatprep.subr.mxu0 %v1849_v23 }
 0x7c0   :  { %1247 = vmatpush1.msra.mxu0 %v1852_v25 }
 0x7c1   :  { %1248 = vmatprep.subr.mxu0 %v1855_v27  ;;  %v522_v27 = vpop.permute.xlu0 %521 }
 0x7c2   :  { %1249 = vmatpush1.msra.mxu0 %v1858_v29  ;;  %v562_v29 = vmul.f32 %v1941_v5, %v522_v27  ;;  %v563_v40 = vmul.f32 %v1957_v62, %v522_v27  ;;  %v1646_v27 = vld [vmem:[#allocation7 + $0x20] sm:$0xff] }
 0x7c3   :  { %1250 = vmatprep.subr.mxu0 %v1861_v31  ;;  %v358_v10 = vpop.permute.xlu1 %357 }
 0x7c4   :  { %1251 = vmatpush1.msra.mxu0 %v1867_v33  ;;  %v398_v19 = vmul.f32 %v1934_v56, %v358_v10  ;;  %v399_v49 = vmul.f32 %v1951_v35, %v358_v10  ;;  %v1636_v10 = vld [vmem:[#allocation7 + $0x70] sm:$0xff] }
 0x7c5   :  { %1252 = vmatprep.subr.mxu0 %v1870_v34 }
 0x7c6   :  { %1253 = vmatpush1.msra.mxu0 %v1876_v36  ;;  %v414_v25 = vadd.f32 %v398_v19, %v332_v21  ;;  %v415_v39 = vadd.f32 %v399_v49, %v333_v2  ;;  %v1642_v19 = vld [vmem:[#allocation7 + $0x40] sm:$0xff]  ;;  %v1643_v21 = vld [vmem:[#allocation7 + $0x38] sm:$0xff] }
 0x7c8   :  { %v440_v17 = vpop.permute.xlu1 %439 }
 0x7c9   :  { %v480_v23 = vmul.f32 %v1936_v61, %v440_v17  ;;  %v481_v43 = vmul.f32 %v1953_v50, %v440_v17  ;;  %v1640_v17 = vld [vmem:[#allocation7 + $0x50] sm:$0xff] }
 0x7cb   :  { %v496_v31 = vadd.f32 %v480_v23, %v414_v25  ;;  %v497_v51 = vadd.f32 %v481_v43, %v415_v39  ;;  %v1644_v23 = vld [vmem:[#allocation7 + $0x30] sm:$0xff]  ;;  %v1645_v25 = vld [vmem:[#allocation7 + $0x28] sm:$0xff] }
 0x7cd   :  { %v578_v33 = vadd.f32 %v562_v29, %v496_v31  ;;  %v579_v38 = vadd.f32 %v563_v40, %v497_v51  ;;  %v1648_v29 = vld [vmem:[#allocation7 + $0x10] sm:$0xff]  ;;  %v1649_v31 = vld [vmem:[#allocation7 + $0x8] sm:$0xff] }
 0x877   :  { %v1082_v34 = vpop.f32.mrf.mxu0 }
 0x878   :  { %v1087_v36 = vadd.f32 %v1082_v34, %v578_v33  ;;  %v1650_v33 = vld [vmem:[#allocation7] sm:$0xff] }
 0x879   :  { %v1084_v24 = vpop.f32.mrf.mxu0 }
 0x87a   :  { %v1483_v11 = vmul.f32 -1.442695, %v1087_v36  ;;  %v1088_v59 = vadd.f32 %v1084_v24, %v579_v38  ;;  %v277_v36 = vpop.permute.xlu0 %276 }
 0x87b   :  { %v318_v8 = vmul.f32 %v1930_v54, %v277_v36 }
 0x87c   :  { %1588 = vpow2.f32 %v1483_v11  ;;  %v1484_v63 = vmul.f32 -1.442695, %v1088_v59 }
 0x87d   :  { %1590 = vtanh.f32 %v1088_v59  ;;  %v334_v2 = vadd.f32 %v318_v8, %v224_v0 }
 0x87e   :  { %v526_v40 = vpop.permute.xlu0 %525 }
 0x87f   :  { %v564_v51 = vmul.f32 %v1941_v5, %v526_v40 }
 0x889   :  { %v1589_v45 = vpop.eup %1588 }
 0x88a   :  { %v1095_v30 = vadd.f32 1.0, %v1589_v45  ;;  %v1591_v7 = vpop.eup %1590 }
 0x88c   :  { %1592 = vrcp.f32 %v1095_v30  ;;  %v319_v30 = vmul.f32 %v1945_v13, %v277_v36 }
 0x88d   :  { %1594 = vpow2.f32 %v1484_v63 }
 0x899   :  { %v1593_v16 = vpop.eup %1592 }
 0x89a   :  { %v1103_v26 = vmul.f32 %v1593_v16, %v1591_v7  ;;  %v1595_v41 = vpop.eup %1594  ;;  %v1102_v9 = vmul.f32 %v1593_v16, %v2180_v3  ;;  %v226_v7 = vadd.f32 %v2117_v22, %v1943_v6 }
 0x89b   :  { %v1096_v48 = vadd.f32 1.0, %v1595_v41 }
 0x89c   :  { %1105 = vrot.lane.b32.xlu1 %v1103_v26, %s1769_s5  ;;  %v335_v26 = vadd.f32 %v319_v30, %v226_v7 }
 0x89d   :  { %1596 = vrcp.f32 %v1096_v48  ;;  %v565_v48 = vmul.f32 %v1957_v62, %v526_v40 }
 0x8aa   :  { %v1597_v52 = vpop.eup %1596 }
 0x90e   :  { %v1106_v60 = vpop.permute.xlu1 %1105 }
 0x90f   :  { %v2220_v47 = vadd.f32 %v1106_v60, %v1102_v9 }
 0x911   :  { %1598 = vtanh.f32 %v2220_v47 }
 0x91e   :  { %v1599_v53 = vpop.eup %1598 }
 0x91f   :  { %v1110_v4 = vmul.f32 %v1599_v53, %v1597_v52 }
 0x921   :  { %1112 = vrot.lane.b32.xlu1 %v1110_v4, %s1769_s5 }
 0x925   :  { %361 = vperm.xlu1 %1529, %v2064_v46  }
 0x929   :  { %1530 = vset.pattern.permute.xlu1 %v2308_v1 }
 0x92a   :  { %443 = vperm.xlu1 %1530, %v2064_v46   ;;  %v1641_v46 = vld [vmem:[#allocation7 + $0x48] sm:$0xff] }
 0x92e   :  { %1533 = vset.pattern.permute.xlu1 %v2309_v37 }
 0x993   :  { %v1113_v3 = vpop.permute.xlu1 %1112 }
 0x994   :  { %1116 = vst.msk [vmem:[#allocation8 + $0x20] sm:$0xff] %vm102_vm0, %v1113_v3  ;;  %1485 = vmatmul.mubr.msk.f32.vlgmr.msra.gmra.mxu1 %vm102_vm0, %v1113_v3 }
 0x995   :  { %1342 = vmatpush1.msra.mxu1 %v1636_v10  ;;  %1389 = vmatprep.mubr.f32.mxu1 %v2310_v28  ;;  %v1647_v28 = vld [vmem:[#allocation7 + $0x18] sm:$0xff] }
 0x996   :  { %1343 = vmatprep.subr.mxu1 %v1637_v12 }
 0x997   :  { %1344 = vmatpush1.msra.mxu1 %v1638_v14 }
 0x998   :  { %1345 = vmatprep.subr.mxu1 %v1639_v15 }
 0x999   :  { %1346 = vmatpush1.msra.mxu1 %v1640_v17 }
 0x99a   :  { %1347 = vmatprep.subr.mxu1 %v1641_v46 }
 0x99b   :  { %1348 = vmatpush1.msra.mxu1 %v1642_v19 }
 0x99c   :  { %1349 = vmatprep.subr.mxu1 %v1643_v21 }
 0x99d   :  { %1350 = vmatpush1.msra.mxu1 %v1644_v23 }
 0x99e   :  { %1351 = vmatprep.subr.mxu1 %v1645_v25 }
 0x99f   :  { %1352 = vmatpush1.msra.mxu1 %v1646_v27 }
 0x9a0   :  { %1353 = vmatprep.subr.mxu1 %v1647_v28  ;;  %v362_v34 = vpop.permute.xlu1 %361 }
 0x9a1   :  { %1354 = vmatpush1.msra.mxu1 %v1648_v29  ;;  %v400_v49 = vmul.f32 %v1934_v56, %v362_v34  ;;  %v401_v16 = vmul.f32 %v1951_v35, %v362_v34  ;;  %v282_v29 = vpop.permute.xlu0 %281 }
 0x9a2   :  { %1355 = vmatprep.subr.mxu1 %v1649_v31  ;;  %v320_v31 = vmul.f32 %v1930_v54, %v282_v29  ;;  %v321_v40 = vmul.f32 %v1945_v13, %v282_v29 }
 0x9a3   :  { %1356 = vmatpush1.msra.mxu1 %v1650_v33  ;;  %v416_v39 = vadd.f32 %v400_v49, %v334_v2  ;;  %v417_v41 = vadd.f32 %v401_v16, %v335_v26  ;;  %v230_v33 = vadd.f32 %v2121_v32, %v1932_v55 }
 0x9a5   :  { %v444_v11 = vpop.permute.xlu1 %443  ;;  %v336_v8 = vadd.f32 %v320_v31, %v230_v33 }
 0x9a6   :  { %v482_v43 = vmul.f32 %v1936_v61, %v444_v11  ;;  %v483_v63 = vmul.f32 %v1953_v50, %v444_v11 }
 0x9a8   :  { %v498_v24 = vadd.f32 %v482_v43, %v416_v39  ;;  %v499_v9 = vadd.f32 %v483_v63, %v417_v41 }
 0x9aa   :  { %v580_v38 = vadd.f32 %v564_v51, %v498_v24  ;;  %v581_v52 = vadd.f32 %v565_v48, %v499_v9  ;;  %v232_v51 = vadd.f32 %v2124_v42, %v1943_v6 }
 0xa54   :  { %v1185_v59 = vpop.f32.mrf.mxu1 }
 0xa55   :  { %v1190_v45 = vadd.f32 %v1185_v59, %v580_v38  ;;  %v337_v38 = vadd.f32 %v321_v40, %v232_v51 }
 0xa56   :  { %v1187_v60 = vpop.f32.mrf.mxu1 }
 0xa57   :  { %v1486_v18 = vmul.f32 -1.442695, %v1190_v45  ;;  %v1191_v53 = vadd.f32 %v1187_v60, %v581_v52 }
 0xa59   :  { %1600 = vpow2.f32 %v1486_v18  ;;  %v1487_v14 = vmul.f32 -1.442695, %v1191_v53 }
 0xa5a   :  { %1602 = vtanh.f32 %v1191_v53 }
 0xa66   :  { %v1601_v4 = vpop.eup %1600 }
 0xa67   :  { %v1198_v3 = vadd.f32 1.0, %v1601_v4  ;;  %v1603_v10 = vpop.eup %1602 }
 0xa69   :  { %1604 = vrcp.f32 %v1198_v3 }
 0xa6a   :  { %1606 = vpow2.f32 %v1487_v14 }
 0xa76   :  { %v1605_v22 = vpop.eup %1604 }
 0xa77   :  { %v1206_v12 = vmul.f32 %v1605_v22, %v1603_v10  ;;  %v1607_v15 = vpop.eup %1606  ;;  %v1205_v46 = vmul.f32 %v1605_v22, %v2220_v47 }
 0xa78   :  { %v1199_v17 = vadd.f32 1.0, %v1607_v15 }
 0xa79   :  { %1208 = vrot.lane.b32.xlu1 %v1206_v12, %s1769_s5 }
 0xa7a   :  { %1608 = vrcp.f32 %v1199_v17 }
 0xa87   :  { %v1609_v23 = vpop.eup %1608 }
 0xaeb   :  { %v1209_v19 = vpop.permute.xlu1 %1208 }
 0xaec   :  { %v1211_v21 = vadd.f32 %v1209_v19, %v1205_v46  ;;  %v236_v19 = vadd.f32 %v2127_v57, %v1932_v55 }
 0xaee   :  { %1610 = vtanh.f32 %v1211_v21 }
 0xafb   :  { %v1611_v25 = vpop.eup %1610 }
 0xafc   :  { %v1213_v27 = vmul.f32 %v1611_v25, %v1609_v23 }
 0xafe   :  { %1215 = vrot.lane.b32.xlu1 %v1213_v27, %s1769_s5 }
 0xb02   :  { %365 = vperm.xlu1 %1533, %v2073_v58  }
 0xb06   :  { %1534 = vset.pattern.permute.xlu1 %v2308_v1 }
 0xb07   :  { %447 = vperm.xlu1 %1534, %v2073_v58  }
 0xb0b   :  { %1537 = vset.pattern.permute.xlu1 %v2309_v37  ;;  %v530_v37 = vpop.permute.xlu0 %529 }
 0xb0c   :  { %v566_v11 = vmul.f32 %v1941_v5, %v530_v37  ;;  %v567_v30 = vmul.f32 %v1957_v62, %v530_v37 }
 0xb0f   :  { %v287_v46 = vpop.permute.xlu0 %286 }
 0xb10   :  { %v323_v55 = vmul.f32 %v1945_v13, %v287_v46 }
 0xb70   :  { %v1216_v28 = vpop.permute.xlu1 %1215 }
 0xb71   :  { %1219 = vst.msk [vmem:[#allocation8 + $0x28] sm:$0xff] %vm102_vm0, %v1216_v28  ;;  %1488 = vmatmul.mubr.msk.f32.vlgmr.msra.gmra.mxu0 %vm102_vm0, %v1216_v28  ;;  %v534_v28 = vpop.permute.xlu0 %533 }
 0xb72   :  { %v568_v29 = vmul.f32 %v1941_v5, %v534_v28 }
 0xb7d   :  { %v366_v47 = vpop.permute.xlu1 %365 }
 0xb7e   :  { %v402_v36 = vmul.f32 %v1934_v56, %v366_v47  ;;  %v403_v24 = vmul.f32 %v1951_v35, %v366_v47 }
 0xb80   :  { %v418_v0 = vadd.f32 %v402_v36, %v336_v8  ;;  %v419_v45 = vadd.f32 %v403_v24, %v337_v38  ;;  %v238_v36 = vadd.f32 %v2132_v20, %v1943_v6 }
 0xb82   :  { %v448_v34 = vpop.permute.xlu1 %447 }
 0xb83   :  { %v484_v58 = vmul.f32 %v1936_v61, %v448_v34  ;;  %v485_v59 = vmul.f32 %v1953_v50, %v448_v34 }
 0xb85   :  { %v500_v49 = vadd.f32 %v484_v58, %v418_v0  ;;  %v501_v7 = vadd.f32 %v485_v59, %v419_v45  ;;  %v569_v0 = vmul.f32 %v1957_v62, %v534_v28 }
 0xb87   :  { %v582_v2 = vadd.f32 %v566_v11, %v500_v49  ;;  %v583_v16 = vadd.f32 %v567_v30, %v501_v7 }
 0xc31   :  { %v1288_v43 = vpop.f32.mrf.mxu0 }
 0xc32   :  { %v1293_v39 = vadd.f32 %v1288_v43, %v582_v2 }
 0xc33   :  { %v1290_v18 = vpop.f32.mrf.mxu0 }
 0xc34   :  { %v1489_v32 = vmul.f32 -1.442695, %v1293_v39  ;;  %v1294_v26 = vadd.f32 %v1290_v18, %v583_v16 }
 0xc36   :  { %1612 = vpow2.f32 %v1489_v32  ;;  %v1490_v60 = vmul.f32 -1.442695, %v1294_v26 }
 0xc37   :  { %1614 = vtanh.f32 %v1294_v26 }
 0xc43   :  { %v1613_v63 = vpop.eup %1612 }
 0xc44   :  { %v1301_v41 = vadd.f32 1.0, %v1613_v63  ;;  %v1615_v48 = vpop.eup %1614 }
 0xc46   :  { %1616 = vrcp.f32 %v1301_v41 }
 0xc47   :  { %1618 = vpow2.f32 %v1490_v60 }
 0xc53   :  { %v1617_v42 = vpop.eup %1616 }
 0xc54   :  { %v1309_v9 = vmul.f32 %v1617_v42, %v1615_v48  ;;  %v1619_v52 = vpop.eup %1618  ;;  %v1308_v4 = vmul.f32 %v1617_v42, %v1211_v21  ;;  %v322_v21 = vmul.f32 %v1930_v54, %v287_v46 }
 0xc55   :  { %v1302_v53 = vadd.f32 1.0, %v1619_v52 }
 0xc56   :  { %1311 = vrot.lane.b32.xlu1 %v1309_v9, %s1769_s5  ;;  %v338_v27 = vadd.f32 %v322_v21, %v236_v19 }
 0xc57   :  { %1620 = vrcp.f32 %v1302_v53 }
 0xc64   :  { %v1621_v22 = vpop.eup %1620 }
 0xcc8   :  { %v1312_v3 = vpop.permute.xlu1 %1311 }
 0xcc9   :  { %v1314_v10 = vadd.f32 %v1312_v3, %v1308_v4 }
 0xccb   :  { %1622 = vtanh.f32 %v1314_v10 }
 0xcd8   :  { %v1623_v12 = vpop.eup %1622 }
 0xcd9   :  { %v1316_v14 = vmul.f32 %v1623_v12, %v1621_v22 }
 0xcdb   :  { %1318 = vrot.lane.b32.xlu1 %v1316_v14, %s1769_s5 }
 0xcdf   :  { %369 = vperm.xlu1 %1537, %v2082_v44  }
 0xce3   :  { %1538 = vset.pattern.permute.xlu1 %v2308_v1 }
 0xce4   :  { %451 = vperm.xlu1 %1538, %v2082_v44  }
 0xd4d   :  { %v1319_v15 = vpop.permute.xlu1 %1318 }
 0xd4e   :  { %1322 = vst.msk [vmem:[#allocation8 + $0x30] sm:$0xff] %vm102_vm0, %v1319_v15  ;;  %1491 = vmatmul.mubr.msk.f32.vlgmr.msra.gmra.mxu1 %vm102_vm0, %v1319_v15 }
 0xd5a   :  { %v370_v17 = vpop.permute.xlu1 %369 }
 0xd5b   :  { %v404_v25 = vmul.f32 %v1934_v56, %v370_v17  ;;  %v405_v57 = vmul.f32 %v1951_v35, %v370_v17  ;;  %v339_v56 = vadd.f32 %v323_v55, %v238_v36 }
 0xd5d   :  { %v420_v44 = vadd.f32 %v404_v25, %v338_v27  ;;  %v421_v8 = vadd.f32 %v405_v57, %v339_v56 }
 0xd5f   :  { %v452_v23 = vpop.permute.xlu1 %451 }
 0xd60   :  { %v486_v1 = vmul.f32 %v1936_v61, %v452_v23  ;;  %v487_v61 = vmul.f32 %v1953_v50, %v452_v23 }
 0xd62   :  { %v502_v47 = vadd.f32 %v486_v1, %v420_v44  ;;  %v503_v58 = vadd.f32 %v487_v61, %v421_v8 }
 0xd64   :  { %v584_v31 = vadd.f32 %v568_v29, %v502_v47  ;;  %v585_v37 = vadd.f32 %v569_v0, %v503_v58 }
 0xe0e   :  { %v1391_v33 = vpop.f32.mrf.mxu1 }
 0xe0f   :  { %v1396_v34 = vadd.f32 %v1391_v33, %v584_v31 }
 0xe10   :  { %v1393_v5 = vpop.f32.mrf.mxu1 }
 0xe11   :  { %v1492_v54 = vmul.f32 -1.442695, %v1396_v34  ;;  %v1397_v11 = vadd.f32 %v1393_v5, %v585_v37 }
 0xe13   :  { %1624 = vpow2.f32 %v1492_v54  ;;  %v1493_v35 = vmul.f32 -1.442695, %v1397_v11 }
 0xe14   :  { %1626 = vtanh.f32 %v1397_v11 }
 0xe20   :  { %v1625_v49 = vpop.eup %1624 }
 0xe21   :  { %v1404_v2 = vadd.f32 1.0, %v1625_v49  ;;  %v1627_v6 = vpop.eup %1626 }
 0xe23   :  { %1628 = vrcp.f32 %v1404_v2 }
 0xe24   :  { %1630 = vpow2.f32 %v1493_v35 }
 0xe30   :  { %v1629_v13 = vpop.eup %1628 }
 0xe31   :  { %v1412_v20 = vmul.f32 %v1629_v13, %v1627_v6  ;;  %v1631_v43 = vpop.eup %1630  ;;  %v1411_v39 = vmul.f32 %v1629_v13, %v1314_v10 }
 0xe32   :  { %v1405_v50 = vadd.f32 1.0, %v1631_v43 }
 0xe33   :  { %1414 = vrot.lane.b32.xlu1 %v1412_v20, %s1769_s5 }
 0xe34   :  { %1632 = vrcp.f32 %v1405_v50 }
 0xe41   :  { %v1633_v62 = vpop.eup %1632 }
 0xea5   :  { %v1415_v40 = vpop.permute.xlu1 %1414 }
 0xea6   :  { %v1417_v51 = vadd.f32 %v1415_v40, %v1411_v39 }
 0xea8   :  { %1634 = vtanh.f32 %v1417_v51  ;;  %1427 = vrot.lane.b32.xlu0 %v1417_v51, %s1769_s5 }
 0xeb5   :  { %v1635_v32 = vpop.eup %1634 }
 0xeb6   :  { %v1419_v24 = vmul.f32 %v1635_v32, %v1633_v62 }
 0xeb8   :  { %1421 = vrot.lane.b32.xlu1 %v1419_v24, %s1769_s5 }
 0xf1a   :  { %v1428_v38 = vpop.permute.xlu0 %1427 }
 0xf1b   :  { %1430 = vst.msk [vmem:[#allocation9] sm:$0xff] %vm102_vm0, %v1428_v38 }
 0xf1c   :  { %1722 = shalt.err (!%p1719_p5)
}
 0xf1d   :  { %1452 = dma.vmem_to_hbm [thread:$0]  %s1450_s22, 128, %s2301_s7, [#allocation10]  }
 0xf1e   :  { %s1771_s26 = smov [#allocation8]  }
 0xf1f   :  { %s1436_s27 = sshll.u32 %s1771_s26, 4  ;;  %s1437_s27 = int_to_ptr.vmem [resolvable:$true] %s1436_s27 }
 0xf20   :  { %s1731_s5 = scalar_lea.vmem %s1437_s27, 1024  ;;  %p1736_p7 = scmp.lt.s32.totalorder %s1437_s27, %s1437_s27 }
 0xf21   :  { %p1732_p6 = scmp.ne.s32.totalorder %s1437_s27, %s1731_s5  ;;  %p1737_p8 = scmp.lt.s32.totalorder %s1731_s5, %s1731_s5 }
 0xf23   :  { %p1738_p9 = por %p1737_p8, %p1736_p7 }
 0xf25   :  { %p1739_p10 = pnand %p1738_p9, %p1732_p6 }
 0xf2a   :  { %v1422_v59 = vpop.permute.xlu1 %1421 }
 0xf2b   :  { %1425 = vst.msk [vmem:[#allocation8 + $0x38] sm:$0xff] %vm102_vm0, %v1422_v59 }
 0xf2c   :  { %1742 = shalt.err (!%p1739_p10)
}
 0xf2d   :  { %s1772_s28 = smov 128   ;;  %s1773_s29 = smov 8  }
 0xf2e   :  { %1442 = dma.vmem_to_hbm [thread:$0]  %s1437_s27, 1024, %s2300_s6, [#allocation4], %s1772_s28, %s1772_s28, %s1773_s29  }
 0xf2f   :  { %1755 = dma.done.wait [#allocation4], 1024  }
 0xf30   :  { %1756 = vsyncadd [#allocation4], 4294966272 }
 0xf31   :  { %1757 = dma.done.wait [#allocation10], 128  }
 0xf32   :  { %1758 = vsyncadd [#allocation10], 4294967168 }
 0xf33   :  { %1459 = vsyncpa [#allocation3], 1 }
 0xf34   :  { %1460 = vsyncpa [#allocation6], 1 }
 0xf35   :  { %1461 = vsyncpa [#allocation4], 1 }
 0xf36   :  { %1462 = vsyncpa [#allocation10], 1 }

</bundles_post_ra>
